<compile_context>
chip_gen: v7x
topology: tpu7x:2x2x1
jax: 0.10.0
libtpu: 0.0.40
codegen_flags: <defaults>
</compile_context>

<pallas_src>
import jax
import jax.numpy as jnp
from jax.experimental import pallas as pl
from jax.experimental.pallas import tpu as pltpu

HIDDEN = 512
LANE = 128
TB_ALIGN = 16  # bf16 sublane packing: keep batch tiles 16-row aligned

# Lazily discovered: does this jax accept pipeline_mode=pl.Buffered(1) on the
# constant (weight/bias) BlockSpecs?  Saves one resident copy of the weights.
_SINGLE_BUFFER_WEIGHTS = True


def _round_up(x, m):
    return (x + m - 1) // m * m


def _cdiv(a, b):
    return (a + b - 1) // b


def mlp_kernel(x_ref, w1_ref, b1_ref, w2_ref, b2_ref, w3_ref, b3_ref,
               o_ref, h_ref):
    # Layer 1: Linear(n_in -> 512) + (dropout = identity in eval) + ReLU.
    # f32 epilogue math, single cast at the bf16 scratch store.
    h = jnp.dot(x_ref[...], w1_ref[...], preferred_element_type=jnp.float32)
    h_ref[...] = jnp.maximum(h + b1_ref[...], 0.0).astype(jnp.bfloat16)

    # Hidden layer: Linear(512 -> 512) + (dropout = identity) + ReLU.
    h = jnp.dot(h_ref[...], w2_ref[...], preferred_element_type=jnp.float32)
    h_ref[...] = jnp.maximum(h + b2_ref[...], 0.0).astype(jnp.bfloat16)

    # Output layer: Linear(512 -> n_out), no activation.
    out = jnp.dot(h_ref[...], w3_ref[...], preferred_element_type=jnp.float32)
    o_ref[...] = (out + b3_ref[...]).astype(o_ref.dtype)


def prepare_params(w1, b1, w2, b2, w3, b3):
    """One-time pad/cast of the weights into the kernel layout (hoisted out of
    the forward path).  Weights stored [in, out]; K (n_in) and N (n_out) padded
    with zeros to lane multiples (128) -- exact math -- matmul operands bf16,
    biases f32 with shape (1, out)."""
    n_in, n_out = w1.shape[0], w3.shape[1]
    n_in_p, n_out_p = _round_up(n_in, LANE), _round_up(n_out, LANE)

    w1p = jnp.zeros((n_in_p, HIDDEN), jnp.bfloat16).at[:n_in, :].set(
        w1.astype(jnp.bfloat16))
    w2p = w2.astype(jnp.bfloat16)
    w3p = jnp.zeros((HIDDEN, n_out_p), jnp.bfloat16).at[:, :n_out].set(
        w3.astype(jnp.bfloat16))
    b1p = jnp.asarray(b1, jnp.float32).reshape(1, HIDDEN)
    b2p = jnp.asarray(b2, jnp.float32).reshape(1, HIDDEN)
    b3p = jnp.zeros((1, n_out_p), jnp.float32).at[:, :n_out].set(
        jnp.asarray(b3, jnp.float32).reshape(1, n_out))

    return dict(n_in=n_in, n_out=n_out, n_in_p=n_in_p, n_out_p=n_out_p,
                w1=w1p, b1=b1p, w2=w2p, b2=b2p, w3=w3p, b3=b3p)


def _build_call(grid_steps, tb, b_p, n_in_p, n_out_p, vmem_limit, cost,
                weight_mode):
    const = lambda i: (0, 0)  # weights/biases: same block every grid step
    if weight_mode is None:
        wspec = lambda shape: pl.BlockSpec(shape, const)
    else:
        wspec = lambda shape: pl.BlockSpec(shape, const,
                                           pipeline_mode=weight_mode)
    return pl.pallas_call(
        mlp_kernel,
        out_shape=jax.ShapeDtypeStruct((b_p, n_out_p), jnp.float32),
        grid_spec=pltpu.PrefetchScalarGridSpec(
            num_scalar_prefetch=0,
            grid=(grid_steps,),
            in_specs=[
                pl.BlockSpec((tb, n_in_p), lambda i: (i, 0)),  # x tile streams
                wspec((n_in_p, HIDDEN)),
                wspec((1, HIDDEN)),
                wspec((HIDDEN, HIDDEN)),
                wspec((1, HIDDEN)),
                wspec((HIDDEN, n_out_p)),
                wspec((1, n_out_p)),
            ],
            out_specs=pl.BlockSpec((tb, n_out_p), lambda i: (i, 0)),
            scratch_shapes=[pltpu.VMEM((tb, HIDDEN), jnp.bfloat16)],
        ),
        compiler_params=pltpu.CompilerParams(
            dimension_semantics=("parallel",),  # batch steps shard across TCs
            vmem_limit_bytes=vmem_limit,
        ),
        cost_estimate=cost,
    )


def mlp_forward(x, params, *, block_b=1024):
    """x: [B, n_in] f32; params from prepare_params().  Returns [B, n_out] f32."""
    global _SINGLE_BUFFER_WEIGHTS

    B, n_in = x.shape
    assert n_in == params["n_in"]
    n_out = params["n_out"]
    n_in_p, n_out_p = params["n_in_p"], params["n_out_p"]

    # Batch tiling: balanced tiles bound padding to <TB_ALIGN rows per tile;
    # force >=2 grid steps once each half still keeps the MXU busy (>=128 rows)
    # so both v7x TensorCores get work.
    num_tiles = _cdiv(B, block_b)
    if num_tiles < 2 and B >= 256:
        num_tiles = 2
    tb = _round_up(_cdiv(B, num_tiles), TB_ALIGN)
    b_p = _round_up(B, tb)
    grid_steps = b_p // tb

    if b_p == B and n_in_p == n_in:
        xp = x.astype(jnp.bfloat16)
    else:
        xp = jnp.zeros((b_p, n_in_p), jnp.bfloat16).at[:B, :n_in].set(
            x.astype(jnp.bfloat16))

    # Explicit VMEM budget (conservatively assumes double-buffered weights).
    weight_bytes = ((n_in_p + HIDDEN + n_out_p) * HIDDEN * 2
                    + (2 * HIDDEN + n_out_p) * 4)
    vmem_used = (2 * weight_bytes
                 + 2 * tb * n_in_p * 2     # double-buffered x tile (bf16)
                 + 2 * tb * n_out_p * 4    # double-buffered out tile (f32)
                 + tb * HIDDEN * 2)        # bf16 hidden scratch
    vmem_limit = min(max(32 << 20, int(1.25 * vmem_used)), 64 << 20)
    if vmem_used > vmem_limit:
        # TODO(synk): add K-tiled reduction over n_in blocks instead of raising.
        raise ValueError(
            f"MLP kernel would exceed VMEM budget ({vmem_used} B); "
            f"reduce block_b or K-tile n_in={n_in}.")

    flops = 2 * b_p * HIDDEN * (n_in_p + HIDDEN + n_out_p)
    bytes_accessed = int(xp.size) * 2 + weight_bytes + b_p * n_out_p * 4
    cost = pl.CostEstimate(flops=flops, transcendentals=0,
                           bytes_accessed=bytes_accessed)

    args = (xp, params["w1"], params["b1"], params["w2"], params["b2"],
            params["w3"], params["b3"])

    out = None
    if _SINGLE_BUFFER_WEIGHTS:
        try:
            out = _build_call(grid_steps, tb, b_p, n_in_p, n_out_p,
                              vmem_limit, cost, pl.Buffered(1))(*args)
        except Exception:
            _SINGLE_BUFFER_WEIGHTS = False  # pipeline_mode unsupported: fall back
    if out is None:
        out = _build_call(grid_steps, tb, b_p, n_in_p, n_out_p,
                          vmem_limit, cost, None)(*args)

    if b_p == B and n_out_p == n_out:
        return out                      # no padding -> skip the slice copy
    return out[:B, :n_out]


def init_params(key, n_inputs, n_outputs):
    """Mimics nn.Linear default init: U(-1/sqrt(fan_in), 1/sqrt(fan_in))."""
    ks = jax.random.split(key, 6)

    def lin(kw, kb, fan_in, fan_out):
        bound = 1.0 / float(fan_in) ** 0.5
        # stored [in, out] (pre-transposed vs. PyTorch's [out, in])
        w = jax.random.uniform(kw, (fan_in, fan_out), jnp.float32, -bound, bound)
        b = jax.random.uniform(kb, (1, fan_out), jnp.float32, -bound, bound)
        return w, b

    w1, b1 = lin(ks[0], ks[1], n_inputs, HIDDEN)
    w2, b2 = lin(ks[2], ks[3], HIDDEN, HIDDEN)
    w3, b3 = lin(ks[4], ks[5], HIDDEN, n_outputs)
    return w1, b1, w2, b2, w3, b3


def mlp_reference(x, raw_params):
    """Plain-JAX reference (eval-mode dropout = identity) using the same
    bf16-operand / f32-accumulate recipe as the kernel."""
    w1, b1, w2, b2, w3, b3 = raw_params
    bf = jnp.bfloat16
    h = jnp.maximum(jnp.dot(x.astype(bf), w1.astype(bf),
                            preferred_element_type=jnp.float32) + b1, 0.0)
    h = jnp.maximum(jnp.dot(h.astype(bf), w2.astype(bf),
                            preferred_element_type=jnp.float32) + b2, 0.0)
    return jnp.dot(h.astype(bf), w3.astype(bf),
                   preferred_element_type=jnp.float32) + b3


if __name__ == "__main__":
    key = jax.random.PRNGKey(0)
    n_inputs, n_outputs = 32, 32
    k_x1, k_x2, k_p = jax.random.split(key, 3)

    raw = init_params(k_p, n_inputs, n_outputs)
    prep = prepare_params(*raw)      # hoisted one-time weight pad/cast

    # Case 1: tiny batch (single grid step, batch padding sliced off).
    x1 = jax.random.normal(k_x1, (8, n_inputs), jnp.float32)
    out1 = jax.block_until_ready(mlp_forward(x1, prep))
    ref1 = mlp_reference(x1, raw)
    assert out1.shape == (8, n_outputs)
    assert jnp.allclose(out1, ref1, atol=5e-3, rtol=5e-3), \
        float(jnp.max(jnp.abs(out1 - ref1)))

    # Case 2: batch that exercises balanced 2-step tiling + row padding.
    x2 = jax.random.normal(k_x2, (260, n_inputs), jnp.float32)
    out2 = jax.block_until_ready(mlp_forward(x2, prep))
    ref2 = mlp_reference(x2, raw)
    assert out2.shape == (260, n_outputs)
    assert jnp.allclose(out2, ref2, atol=5e-3, rtol=5e-3), \
        float(jnp.max(jnp.abs(out2 - ref2)))

    print("KERNEL_OK")
</pallas_src>

<mosaic_0001>
module attributes {stable_mosaic.version = 11 : i64} {
  func.func @mlp_kernel(%arg0: i32, %arg1: memref<16x128xbf16, #tpu.memory_space<vmem>>, %arg2: memref<128x512xbf16, #tpu.memory_space<vmem>>, %arg3: memref<1x512xf32, #tpu.memory_space<vmem>>, %arg4: memref<512x512xbf16, #tpu.memory_space<vmem>>, %arg5: memref<1x512xf32, #tpu.memory_space<vmem>>, %arg6: memref<512x128xbf16, #tpu.memory_space<vmem>>, %arg7: memref<1x128xf32, #tpu.memory_space<vmem>>, %arg8: memref<16x128xf32, #tpu.memory_space<vmem>>, %arg9: memref<16x512xbf16, #tpu.memory_space<vmem>>) attributes {dimension_semantics = [#tpu.dimension_semantics<parallel>], iteration_bounds = array<i64: 1>, scalar_prefetch = 0 : i64, scratch_operands = 1 : i64, tpu.core_type = #tpu.core_type<tc>, window_params = [{transform_indices = @transform_0, window_bounds = array<i64: 16, 128>}, {pipeline_mode = #tpu.pipeline_mode<synchronous>, transform_indices = @transform_1, window_bounds = array<i64: 128, 512>}, {pipeline_mode = #tpu.pipeline_mode<synchronous>, transform_indices = @transform_2, window_bounds = array<i64: 1, 512>}, {pipeline_mode = #tpu.pipeline_mode<synchronous>, transform_indices = @transform_3, window_bounds = array<i64: 512, 512>}, {pipeline_mode = #tpu.pipeline_mode<synchronous>, transform_indices = @transform_4, window_bounds = array<i64: 1, 512>}, {pipeline_mode = #tpu.pipeline_mode<synchronous>, transform_indices = @transform_5, window_bounds = array<i64: 512, 128>}, {pipeline_mode = #tpu.pipeline_mode<synchronous>, transform_indices = @transform_6, window_bounds = array<i64: 1, 128>}, {transform_indices = @transform_7, window_bounds = array<i64: 16, 128>}]} {
    %c0 = arith.constant 0 : index
    %c0_0 = arith.constant 0 : index
    %0 = vector.load %arg1[%c0, %c0_0] : memref<16x128xbf16, #tpu.memory_space<vmem>>, vector<16x128xbf16>
    %c0_1 = arith.constant 0 : index
    %c0_2 = arith.constant 0 : index
    %1 = vector.load %arg2[%c0_1, %c0_2] : memref<128x512xbf16, #tpu.memory_space<vmem>>, vector<128x512xbf16>
    %cst = arith.constant dense<0.000000e+00> : vector<16x512xf32>
    %2 = tpu.matmul %0, %1, %cst {dimension_numbers = #tpu.dot_dimension_numbers<[1], [0], [0], [1], [0, 0, 1, 1], [], []>} : vector<16x128xbf16>, vector<128x512xbf16>, vector<16x512xf32> -> vector<16x512xf32>
    %c0_3 = arith.constant 0 : index
    %c0_4 = arith.constant 0 : index
    %3 = vector.load %arg3[%c0_3, %c0_4] : memref<1x512xf32, #tpu.memory_space<vmem>>, vector<1x512xf32>
    %4 = vector.broadcast %3 : vector<1x512xf32> to vector<16x512xf32>
    %5 = arith.addf %2, %4 : vector<16x512xf32>
    %cst_5 = arith.constant 0.000000e+00 : f32
    %6 = vector.broadcast %cst_5 : f32 to vector<16x512xf32>
    %7 = arith.maximumf %5, %6 : vector<16x512xf32>
    %8 = arith.truncf %7 : vector<16x512xf32> to vector<16x512xbf16>
    %c0_6 = arith.constant 0 : index
    %c0_7 = arith.constant 0 : index
    %9 = vector.load %arg9[%c0_6, %c0_7] : memref<16x512xbf16, #tpu.memory_space<vmem>>, vector<16x512xbf16>
    tpu.vector_store %arg9[%c0_6, %c0_7], %8 {strides = array<i32>} : memref<16x512xbf16, #tpu.memory_space<vmem>>, vector<16x512xbf16>,
    %c0_8 = arith.constant 0 : index
    %c0_9 = arith.constant 0 : index
    %10 = vector.load %arg9[%c0_8, %c0_9] : memref<16x512xbf16, #tpu.memory_space<vmem>>, vector<16x512xbf16>
    %c0_10 = arith.constant 0 : index
    %c0_11 = arith.constant 0 : index
    %11 = vector.load %arg4[%c0_10, %c0_11] : memref<512x512xbf16, #tpu.memory_space<vmem>>, vector<512x512xbf16>
    %cst_12 = arith.constant dense<0.000000e+00> : vector<16x512xf32>
    %12 = tpu.matmul %10, %11, %cst_12 {dimension_numbers = #tpu.dot_dimension_numbers<[1], [0], [0], [1], [0, 0, 1, 1], [], []>} : vector<16x512xbf16>, vector<512x512xbf16>, vector<16x512xf32> -> vector<16x512xf32>
    %c0_13 = arith.constant 0 : index
    %c0_14 = arith.constant 0 : index
    %13 = vector.load %arg5[%c0_13, %c0_14] : memref<1x512xf32, #tpu.memory_space<vmem>>, vector<1x512xf32>
    %14 = vector.broadcast %13 : vector<1x512xf32> to vector<16x512xf32>
    %15 = arith.addf %12, %14 : vector<16x512xf32>
    %cst_15 = arith.constant 0.000000e+00 : f32
    %16 = vector.broadcast %cst_15 : f32 to vector<16x512xf32>
    %17 = arith.maximumf %15, %16 : vector<16x512xf32>
    %18 = arith.truncf %17 : vector<16x512xf32> to vector<16x512xbf16>
    %c0_16 = arith.constant 0 : index
    %c0_17 = arith.constant 0 : index
    %19 = vector.load %arg9[%c0_16, %c0_17] : memref<16x512xbf16, #tpu.memory_space<vmem>>, vector<16x512xbf16>
    tpu.vector_store %arg9[%c0_16, %c0_17], %18 {strides = array<i32>} : memref<16x512xbf16, #tpu.memory_space<vmem>>, vector<16x512xbf16>,
    %c0_18 = arith.constant 0 : index
    %c0_19 = arith.constant 0 : index
    %20 = vector.load %arg9[%c0_18, %c0_19] : memref<16x512xbf16, #tpu.memory_space<vmem>>, vector<16x512xbf16>
    %c0_20 = arith.constant 0 : index
    %c0_21 = arith.constant 0 : index
    %21 = vector.load %arg6[%c0_20, %c0_21] : memref<512x128xbf16, #tpu.memory_space<vmem>>, vector<512x128xbf16>
    %cst_22 = arith.constant dense<0.000000e+00> : vector<16x128xf32>
    %22 = tpu.matmul %20, %21, %cst_22 {dimension_numbers = #tpu.dot_dimension_numbers<[1], [0], [0], [1], [0, 0, 1, 1], [], []>} : vector<16x512xbf16>, vector<512x128xbf16>, vector<16x128xf32> -> vector<16x128xf32>
    %c0_23 = arith.constant 0 : index
    %c0_24 = arith.constant 0 : index
    %23 = vector.load %arg7[%c0_23, %c0_24] : memref<1x128xf32, #tpu.memory_space<vmem>>, vector<1x128xf32>
    %24 = vector.broadcast %23 : vector<1x128xf32> to vector<16x128xf32>
    %25 = arith.addf %22, %24 : vector<16x128xf32>
    %c0_25 = arith.constant 0 : index
    %c0_26 = arith.constant 0 : index
    %26 = vector.load %arg8[%c0_25, %c0_26] : memref<16x128xf32, #tpu.memory_space<vmem>>, vector<16x128xf32>
    tpu.vector_store %arg8[%c0_25, %c0_26], %25 {strides = array<i32>} : memref<16x128xf32, #tpu.memory_space<vmem>>, vector<16x128xf32>,
    return
  }
  func.func @transform_0(%arg0: i32) -> (i32, i32) {
    %c0_i32 = arith.constant 0 : i32
    %c0_i32_0 = arith.constant 0 : i32
    return %arg0, %c0_i32 : i32, i32
  }
  func.func @transform_1(%arg0: i32) -> (i32, i32) {
    %c0_i32 = arith.constant 0 : i32
    %c0_i32_0 = arith.constant 0 : i32
    %c0_i32_1 = arith.constant 0 : i32
    return %c0_i32, %c0_i32_0 : i32, i32
  }
  func.func @transform_2(%arg0: i32) -> (i32, i32) {
    %c0_i32 = arith.constant 0 : i32
    %c0_i32_0 = arith.constant 0 : i32
    %c0_i32_1 = arith.constant 0 : i32
    return %c0_i32, %c0_i32_0 : i32, i32
  }
  func.func @transform_3(%arg0: i32) -> (i32, i32) {
    %c0_i32 = arith.constant 0 : i32
    %c0_i32_0 = arith.constant 0 : i32
    %c0_i32_1 = arith.constant 0 : i32
    return %c0_i32, %c0_i32_0 : i32, i32
  }
  func.func @transform_4(%arg0: i32) -> (i32, i32) {
    %c0_i32 = arith.constant 0 : i32
    %c0_i32_0 = arith.constant 0 : i32
    %c0_i32_1 = arith.constant 0 : i32
    return %c0_i32, %c0_i32_0 : i32, i32
  }
  func.func @transform_5(%arg0: i32) -> (i32, i32) {
    %c0_i32 = arith.constant 0 : i32
    %c0_i32_0 = arith.constant 0 : i32
    %c0_i32_1 = arith.constant 0 : i32
    return %c0_i32, %c0_i32_0 : i32, i32
  }
  func.func @transform_6(%arg0: i32) -> (i32, i32) {
    %c0_i32 = arith.constant 0 : i32
    %c0_i32_0 = arith.constant 0 : i32
    %c0_i32_1 = arith.constant 0 : i32
    return %c0_i32, %c0_i32_0 : i32, i32
  }
  func.func @transform_7(%arg0: i32) -> (i32, i32) {
    %c0_i32 = arith.constant 0 : i32
    %c0_i32_0 = arith.constant 0 : i32
    return %arg0, %c0_i32 : i32, i32
  }
}

module attributes {stable_mosaic.version = 11 : i64} {
  func.func @mlp_kernel(%arg0: i32, %arg1: memref<16x128xbf16, #tpu.memory_space<vmem>>, %arg2: memref<128x512xbf16, #tpu.memory_space<vmem>>, %arg3: memref<1x512xf32, #tpu.memory_space<vmem>>, %arg4: memref<512x512xbf16, #tpu.memory_space<vmem>>, %arg5: memref<1x512xf32, #tpu.memory_space<vmem>>, %arg6: memref<512x128xbf16, #tpu.memory_space<vmem>>, %arg7: memref<1x128xf32, #tpu.memory_space<vmem>>, %arg8: memref<16x128xf32, #tpu.memory_space<vmem>>, %arg9: memref<16x512xbf16, #tpu.memory_space<vmem>>) attributes {dimension_semantics = [#tpu.dimension_semantics<parallel>], iteration_bounds = array<i64: 1>, scalar_prefetch = 0 : i64, scratch_operands = 1 : i64, tpu.core_type = #tpu.core_type<tc>, window_params = [{transform_indices = @transform_0, window_bounds = array<i64: 16, 128>}, {pipeline_mode = #tpu.pipeline_mode<synchronous>, transform_indices = @transform_1, window_bounds = array<i64: 128, 512>}, {pipeline_mode = #tpu.pipeline_mode<synchronous>, transform_indices = @transform_2, window_bounds = array<i64: 1, 512>}, {pipeline_mode = #tpu.pipeline_mode<synchronous>, transform_indices = @transform_3, window_bounds = array<i64: 512, 512>}, {pipeline_mode = #tpu.pipeline_mode<synchronous>, transform_indices = @transform_4, window_bounds = array<i64: 1, 512>}, {pipeline_mode = #tpu.pipeline_mode<synchronous>, transform_indices = @transform_5, window_bounds = array<i64: 512, 128>}, {pipeline_mode = #tpu.pipeline_mode<synchronous>, transform_indices = @transform_6, window_bounds = array<i64: 1, 128>}, {transform_indices = @transform_7, window_bounds = array<i64: 16, 128>}]} {
    %c0 = arith.constant 0 : index
    %c0_0 = arith.constant 0 : index
    %0 = vector.load %arg1[%c0, %c0_0] : memref<16x128xbf16, #tpu.memory_space<vmem>>, vector<16x128xbf16>
    %c0_1 = arith.constant 0 : index
    %c0_2 = arith.constant 0 : index
    %1 = vector.load %arg2[%c0_1, %c0_2] : memref<128x512xbf16, #tpu.memory_space<vmem>>, vector<128x512xbf16>
    %cst = arith.constant dense<0.000000e+00> : vector<16x512xf32>
    %2 = tpu.matmul %0, %1, %cst {dimension_numbers = #tpu.dot_dimension_numbers<[1], [0], [0], [1], [0, 0, 1, 1], [], []>} : vector<16x128xbf16>, vector<128x512xbf16>, vector<16x512xf32> -> vector<16x512xf32>
    %c0_3 = arith.constant 0 : index
    %c0_4 = arith.constant 0 : index
    %3 = vector.load %arg3[%c0_3, %c0_4] : memref<1x512xf32, #tpu.memory_space<vmem>>, vector<1x512xf32>
    %4 = vector.broadcast %3 : vector<1x512xf32> to vector<16x512xf32>
    %5 = arith.addf %2, %4 : vector<16x512xf32>
    %cst_5 = arith.constant 0.000000e+00 : f32
    %6 = vector.broadcast %cst_5 : f32 to vector<16x512xf32>
    %7 = arith.maximumf %5, %6 : vector<16x512xf32>
    %8 = arith.truncf %7 : vector<16x512xf32> to vector<16x512xbf16>
    %c0_6 = arith.constant 0 : index
    %c0_7 = arith.constant 0 : index
    %9 = vector.load %arg9[%c0_6, %c0_7] : memref<16x512xbf16, #tpu.memory_space<vmem>>, vector<16x512xbf16>
    tpu.vector_store %arg9[%c0_6, %c0_7], %8 {strides = array<i32>} : memref<16x512xbf16, #tpu.memory_space<vmem>>, vector<16x512xbf16>,
    %c0_8 = arith.constant 0 : index
    %c0_9 = arith.constant 0 : index
    %10 = vector.load %arg9[%c0_8, %c0_9] : memref<16x512xbf16, #tpu.memory_space<vmem>>, vector<16x512xbf16>
    %c0_10 = arith.constant 0 : index
    %c0_11 = arith.constant 0 : index
    %11 = vector.load %arg4[%c0_10, %c0_11] : memref<512x512xbf16, #tpu.memory_space<vmem>>, vector<512x512xbf16>
    %cst_12 = arith.constant dense<0.000000e+00> : vector<16x512xf32>
    %12 = tpu.matmul %10, %11, %cst_12 {dimension_numbers = #tpu.dot_dimension_numbers<[1], [0], [0], [1], [0, 0, 1, 1], [], []>} : vector<16x512xbf16>, vector<512x512xbf16>, vector<16x512xf32> -> vector<16x512xf32>
    %c0_13 = arith.constant 0 : index
    %c0_14 = arith.constant 0 : index
    %13 = vector.load %arg5[%c0_13, %c0_14] : memref<1x512xf32, #tpu.memory_space<vmem>>, vector<1x512xf32>
    %14 = vector.broadcast %13 : vector<1x512xf32> to vector<16x512xf32>
    %15 = arith.addf %12, %14 : vector<16x512xf32>
    %cst_15 = arith.constant 0.000000e+00 : f32
    %16 = vector.broadcast %cst_15 : f32 to vector<16x512xf32>
    %17 = arith.maximumf %15, %16 : vector<16x512xf32>
    %18 = arith.truncf %17 : vector<16x512xf32> to vector<16x512xbf16>
    %c0_16 = arith.constant 0 : index
    %c0_17 = arith.constant 0 : index
    %19 = vector.load %arg9[%c0_16, %c0_17] : memref<16x512xbf16, #tpu.memory_space<vmem>>, vector<16x512xbf16>
    tpu.vector_store %arg9[%c0_16, %c0_17], %18 {strides = array<i32>} : memref<16x512xbf16, #tpu.memory_space<vmem>>, vector<16x512xbf16>,
    %c0_18 = arith.constant 0 : index
    %c0_19 = arith.constant 0 : index
    %20 = vector.load %arg9[%c0_18, %c0_19] : memref<16x512xbf16, #tpu.memory_space<vmem>>, vector<16x512xbf16>
    %c0_20 = arith.constant 0 : index
    %c0_21 = arith.constant 0 : index
    %21 = vector.load %arg6[%c0_20, %c0_21] : memref<512x128xbf16, #tpu.memory_space<vmem>>, vector<512x128xbf16>
    %cst_22 = arith.constant dense<0.000000e+00> : vector<16x128xf32>
    %22 = tpu.matmul %20, %21, %cst_22 {dimension_numbers = #tpu.dot_dimension_numbers<[1], [0], [0], [1], [0, 0, 1, 1], [], []>} : vector<16x512xbf16>, vector<512x128xbf16>, vector<16x128xf32> -> vector<16x128xf32>
    %c0_23 = arith.constant 0 : index
    %c0_24 = arith.constant 0 : index
    %23 = vector.load %arg7[%c0_23, %c0_24] : memref<1x128xf32, #tpu.memory_space<vmem>>, vector<1x128xf32>
    %24 = vector.broadcast %23 : vector<1x128xf32> to vector<16x128xf32>
    %25 = arith.addf %22, %24 : vector<16x128xf32>
    %c0_25 = arith.constant 0 : index
    %c0_26 = arith.constant 0 : index
    %26 = vector.load %arg8[%c0_25, %c0_26] : memref<16x128xf32, #tpu.memory_space<vmem>>, vector<16x128xf32>
    tpu.vector_store %arg8[%c0_25, %c0_26], %25 {strides = array<i32>} : memref<16x128xf32, #tpu.memory_space<vmem>>, vector<16x128xf32>,
    return
  }
  func.func @transform_0(%arg0: i32) -> (i32, i32) {
    %c0_i32 = arith.constant 0 : i32
    %c0_i32_0 = arith.constant 0 : i32
    return %arg0, %c0_i32 : i32, i32
  }
  func.func @transform_1(%arg0: i32) -> (i32, i32) {
    %c0_i32 = arith.constant 0 : i32
    %c0_i32_0 = arith.constant 0 : i32
    %c0_i32_1 = arith.constant 0 : i32
    return %c0_i32, %c0_i32_0 : i32, i32
  }
  func.func @transform_2(%arg0: i32) -> (i32, i32) {
    %c0_i32 = arith.constant 0 : i32
    %c0_i32_0 = arith.constant 0 : i32
    %c0_i32_1 = arith.constant 0 : i32
    return %c0_i32, %c0_i32_0 : i32, i32
  }
  func.func @transform_3(%arg0: i32) -> (i32, i32) {
    %c0_i32 = arith.constant 0 : i32
    %c0_i32_0 = arith.constant 0 : i32
    %c0_i32_1 = arith.constant 0 : i32
    return %c0_i32, %c0_i32_0 : i32, i32
  }
  func.func @transform_4(%arg0: i32) -> (i32, i32) {
    %c0_i32 = arith.constant 0 : i32
    %c0_i32_0 = arith.constant 0 : i32
    %c0_i32_1 = arith.constant 0 : i32
    return %c0_i32, %c0_i32_0 : i32, i32
  }
  func.func @transform_5(%arg0: i32) -> (i32, i32) {
    %c0_i32 = arith.constant 0 : i32
    %c0_i32_0 = arith.constant 0 : i32
    %c0_i32_1 = arith.constant 0 : i32
    return %c0_i32, %c0_i32_0 : i32, i32
  }
  func.func @transform_6(%arg0: i32) -> (i32, i32) {
    %c0_i32 = arith.constant 0 : i32
    %c0_i32_0 = arith.constant 0 : i32
    %c0_i32_1 = arith.constant 0 : i32
    return %c0_i32, %c0_i32_0 : i32, i32
  }
  func.func @transform_7(%arg0: i32) -> (i32, i32) {
    %c0_i32 = arith.constant 0 : i32
    %c0_i32_0 = arith.constant 0 : i32
    return %arg0, %c0_i32 : i32, i32
  }
}

</mosaic_0001>

<bundles_post_ra>
// kernel: tpu_custom_call.1
= control target key start
LH: loop header
LB: loop body
LE: loop exit
PB: predicated region body
PF: predicated region fallthrough
CT: control target
= control target key end

     0   :  { %12 = vsyncpa [#allocation4], 0  ;;  %s2582_s0 = inlined_call_operand.hbm [shape: bf16[16,128], index: 0, kind: input, shape index: {}]   ;;  %s2583_s1 = inlined_call_operand.hbm [shape: bf16[128,512], index: 1, kind: input, shape index: {}]   ;;  %s2584_s2 = inlined_call_operand.vmem [shape: f32[1,512], index: 2, kind: input, shape index: {}]   ;;  %s2585_s3 = inlined_call_operand.hbm [shape: bf16[512,512], index: 3, kind: input, shape index: {}]   ;;  %s2586_s4 = inlined_call_operand.vmem [shape: f32[1,512], index: 4, kind: input, shape index: {}]   ;;  %s2587_s5 = inlined_call_operand.hbm [shape: bf16[512,128], index: 5, kind: input, shape index: {}]   ;;  %s2588_s6 = inlined_call_operand.vmem [shape: f32[1,128], index: 6, kind: input, shape index: {}]   ;;  %s2589_s7 = inlined_call_operand.hbm [shape: f32[16,128], index: 7, kind: output, shape index: {}]  }
   0x1   :  { %13 = vsyncpa [#allocation7], 0 }
   0x2   :  { %14 = vsyncpa [#allocation10], 0 }
   0x3   :  { %15 = vsyncpa [#allocation5], 0  ;;  %s2416_s24 = smov [#allocation6]   ;;  %s2298_s28 = scalar_lea.hbm %s2583_s1, 4096 }
   0x4   :  { %s33_s25 = sshll.u32 %s2416_s24, 4  ;;  %p2299_p0 = scmp.ne.s32.totalorder %s2583_s1, %s2298_s28  ;;  %s34_s25 = int_to_ptr.vmem [resolvable:$true] %s33_s25 }
   0x5   :  { %p2302_p1 = scmp.lt.u32.totalorder %s2298_s28, %s2583_s1 }
   0x7   :  { %p2304_p2 = pnand %p2302_p1, %p2299_p0 }
   0x9   :  { %2307 = shalt.err (!%p2304_p2)
}
   0xa   :  { %s2308_s10 = scalar_lea.vmem %s34_s25, 4096  ;;  %p2313_p4 = scmp.lt.s32.totalorder %s34_s25, %s34_s25 }
   0xb   :  { %p2309_p3 = scmp.ne.s32.totalorder %s34_s25, %s2308_s10  ;;  %p2314_p5 = scmp.lt.s32.totalorder %s2308_s10, %s2308_s10 }
   0xd   :  { %p2315_p6 = por %p2314_p5, %p2313_p4 }
   0xf   :  { %p2316_p7 = pnand %p2315_p6, %p2309_p3 }
  0x11   :  { %2319 = shalt.err (!%p2316_p7)
}
  0x12   :  { %s2417_s11 = smov 256   ;;  %s2418_s12 = smov 16  }
  0x13   :  { %39 = dma.hbm_to_vmem [thread:$0]  %s2583_s1, 4096, %s34_s25, [#allocation7], %s2417_s11, %s2417_s11, %s2418_s12  }
  0x14   :  { %s2419_s15 = smov [#allocation3]   ;;  %s2320_s19 = scalar_lea.hbm %s2582_s0, 128 }
  0x15   :  { %s21_s16 = sshll.u32 %s2419_s15, 4  ;;  %p2321_p8 = scmp.ne.s32.totalorder %s2582_s0, %s2320_s19  ;;  %s22_s16 = int_to_ptr.vmem [resolvable:$true] %s21_s16 }
  0x16   :  { %p2324_p9 = scmp.lt.u32.totalorder %s2320_s19, %s2582_s0 }
  0x18   :  { %p2326_p10 = pnand %p2324_p9, %p2321_p8 }
  0x1a   :  { %2329 = shalt.err (!%p2326_p10)
}
  0x1b   :  { %s2330_s24 = scalar_lea.vmem %s22_s16, 128  ;;  %p2335_p12 = scmp.lt.s32.totalorder %s22_s16, %s22_s16 }
  0x1c   :  { %p2331_p11 = scmp.ne.s32.totalorder %s22_s16, %s2330_s24  ;;  %p2336_p13 = scmp.lt.s32.totalorder %s2330_s24, %s2330_s24 }
  0x1e   :  { %p2337_p0 = por %p2336_p13, %p2335_p12 }
  0x20   :  { %p2338_p1 = pnand %p2337_p0, %p2331_p11 }
  0x22   :  { %2341 = shalt.err (!%p2338_p1)
}
  0x23   :  { %s2420_s1 = smov 64   ;;  %s2421_s25 = smov 4  }
  0x24   :  { %27 = dma.hbm_to_vmem [thread:$0]  %s2582_s0, 128, %s22_s16, [#allocation4], %s2420_s1, %s2420_s1, %s2421_s25  }
  0x25   :  { %s2422_s28 = smov [#allocation8]   ;;  %s2423_s30 = smov [#allocation9]  }
  0x26   :  { %s47_s29 = sshll.u32 %s2422_s28, 4  ;;  %s61_s8 = sshll.u32 %s2423_s30, 4  ;;  %s48_s29 = int_to_ptr.vmem [resolvable:$true] %s47_s29  ;;  %s2498_s8 = int_to_ptr.vmem [resolvable:$true] %s61_s8 }
  0x27   :  { %s2342_s13 = scalar_lea.hbm %s2585_s3, 16384 }
  0x28   :  { %p2343_p2 = scmp.ne.s32.totalorder %s2585_s3, %s2342_s13  ;;  %p2346_p3 = scmp.lt.u32.totalorder %s2342_s13, %s2585_s3 }
  0x2a   :  { %p2348_p4 = pnand %p2346_p3, %p2343_p2 }
  0x2c   :  { %2351 = shalt.err (!%p2348_p4)
}
  0x2d   :  { %s2352_s0 = scalar_lea.vmem %s48_s29, 16384  ;;  %p2357_p6 = scmp.lt.s32.totalorder %s48_s29, %s48_s29 }
  0x2e   :  { %p2353_p5 = scmp.ne.s32.totalorder %s48_s29, %s2352_s0  ;;  %p2358_p7 = scmp.lt.s32.totalorder %s2352_s0, %s2352_s0 }
  0x30   :  { %p2359_p8 = por %p2358_p7, %p2357_p6 }
  0x32   :  { %p2360_p9 = pnand %p2359_p8, %p2353_p5 }
  0x34   :  { %2363 = shalt.err (!%p2360_p9)
}
  0x35   :  { %53 = dma.hbm_to_vmem [thread:$0]  %s2585_s3, 16384, %s48_s29, [#allocation7], %s2417_s11, %s2417_s11, %s2418_s12  }
  0x36   :  { %s2364_s22 = scalar_lea.hbm %s2587_s5, 4096 }
  0x37   :  { %p2365_p10 = scmp.ne.s32.totalorder %s2587_s5, %s2364_s22  ;;  %p2368_p11 = scmp.lt.u32.totalorder %s2364_s22, %s2587_s5 }
  0x39   :  { %p2370_p12 = pnand %p2368_p11, %p2365_p10 }
  0x3b   :  { %2373 = shalt.err (!%p2370_p12)
}
  0x3c   :  { %s2374_s28 = scalar_lea.vmem %s2498_s8, 4096  ;;  %p2379_p0 = scmp.lt.s32.totalorder %s2498_s8, %s2498_s8 }
  0x3d   :  { %p2375_p13 = scmp.ne.s32.totalorder %s2498_s8, %s2374_s28  ;;  %p2380_p1 = scmp.lt.s32.totalorder %s2374_s28, %s2374_s28 }
  0x3f   :  { %p2381_p2 = por %p2380_p1, %p2379_p0 }
  0x41   :  { %p2382_p3 = pnand %p2381_p2, %p2375_p13 }
  0x43   :  { %2385 = shalt.err (!%p2382_p3)
}
  0x44   :  { %67 = dma.hbm_to_vmem [thread:$0]  %s2587_s5, 4096, %s2498_s8, [#allocation10], %s2420_s1, %s2420_s1, %s2421_s25  }
  0x45   :  { %2408 = dma.done.wait [#allocation4], 128  }
  0x46   :  { %2409 = vsyncadd [#allocation4], 4294967168 }
  0x47   :  { %2410 = dma.done.wait [#allocation7], 20480  }
  0x48   :  { %2411 = vsyncadd [#allocation7], 4294946816 }
  0x49   :  { %2412 = dma.done.wait [#allocation10], 4096  }
  0x4a   :  { %2413 = vsyncadd [#allocation10], 4294963200  ;;  %v2424_v0 = vmov 0   ;;  %v2025_v1 = vld [vmem:[#allocation6 + $0x4] ss:$16 sps:$4 sm:$0xff]   ;;  %v2049_v29 = vld [vmem:[#allocation3] sm:$0xff]  }
  0x4b   :  { %337 = vmatprep.mubr.bf16.mxu0 %v2424_v0  ;;  %380 = vmatprep.mubr.bf16.mxu1 %v2424_v0  ;;  %v2027_v2 = vld [vmem:[#allocation6] ss:$16 sps:$4 sm:$0xff]   ;;  %v2028_v3 = vld [vmem:[#allocation6 + $0x24] ss:$16 sps:$4 sm:$0xff]   ;;  %v2050_v10 = vld [vmem:[#allocation6 + $0xc] ss:$16 sps:$4 sm:$0xff]  }
  0x4c   :  { %305 = vmatprep.subr.bf16.mxu0 %v2025_v1  ;;  %v2030_v4 = vld [vmem:[#allocation6 + $0x20] ss:$16 sps:$4 sm:$0xff]   ;;  %v2031_v5 = vld [vmem:[#allocation6 + $0x44] ss:$16 sps:$4 sm:$0xff]   ;;  %v2052_v11 = vld [vmem:[#allocation6 + $0x8] ss:$16 sps:$4 sm:$0xff]   ;;  %348 = vmatprep.subr.bf16.mxu1 %v2050_v10 }
  0x4d   :  { %306 = vmatpush1.bf16.msra.mxu0 %v2027_v2  ;;  %v2033_v6 = vld [vmem:[#allocation6 + $0x40] ss:$16 sps:$4 sm:$0xff]   ;;  %v2034_v7 = vld [vmem:[#allocation6 + $0x64] ss:$16 sps:$4 sm:$0xff]   ;;  %v2053_v12 = vld [vmem:[#allocation6 + $0x2c] ss:$16 sps:$4 sm:$0xff]   ;;  %349 = vmatpush1.bf16.msra.mxu1 %v2052_v11 }
  0x4e   :  { %307 = vmatprep.subr.bf16.mxu0 %v2028_v3  ;;  %v2036_v8 = vld [vmem:[#allocation6 + $0x60] ss:$16 sps:$4 sm:$0xff]   ;;  %v2037_v9 = vld [vmem:[#allocation6 + $0x84] ss:$16 sps:$4 sm:$0xff]   ;;  %v2055_v14 = vld [vmem:[#allocation6 + $0x28] ss:$16 sps:$4 sm:$0xff]   ;;  %350 = vmatprep.subr.bf16.mxu1 %v2053_v12 }
  0x4f   :  { %v2039_v13 = vld [vmem:[#allocation6 + $0x80] ss:$16 sps:$4 sm:$0xff]   ;;  %v2040_v15 = vld [vmem:[#allocation6 + $0xa4] ss:$16 sps:$4 sm:$0xff]   ;;  %v2056_v16 = vld [vmem:[#allocation6 + $0x4c] ss:$16 sps:$4 sm:$0xff]  }
  0x50   :  { %v2042_v17 = vld [vmem:[#allocation6 + $0xa0] ss:$16 sps:$4 sm:$0xff]   ;;  %v2058_v18 = vld [vmem:[#allocation6 + $0x48] ss:$16 sps:$4 sm:$0xff]   ;;  %v2043_v19 = vld [vmem:[#allocation6 + $0xc4] ss:$16 sps:$4 sm:$0xff]  }
  0x51   :  { %308 = vmatpush1.bf16.msra.mxu0 %v2030_v4  ;;  %351 = vmatpush1.bf16.msra.mxu1 %v2055_v14  ;;  %v2059_v20 = vld [vmem:[#allocation6 + $0x6c] ss:$16 sps:$4 sm:$0xff]   ;;  %v2045_v21 = vld [vmem:[#allocation6 + $0xc0] ss:$16 sps:$4 sm:$0xff]   ;;  %v2061_v22 = vld [vmem:[#allocation6 + $0x68] ss:$16 sps:$4 sm:$0xff]  }
  0x52   :  { %309 = vmatprep.subr.bf16.mxu0 %v2031_v5  ;;  %352 = vmatprep.subr.bf16.mxu1 %v2056_v16  ;;  %v2046_v23 = vld [vmem:[#allocation6 + $0xe4] ss:$16 sps:$4 sm:$0xff]   ;;  %v2062_v24 = vld [vmem:[#allocation6 + $0x8c] ss:$16 sps:$4 sm:$0xff]   ;;  %v2048_v25 = vld [vmem:[#allocation6 + $0xe0] ss:$16 sps:$4 sm:$0xff]  }
  0x53   :  { %v2064_v26 = vld [vmem:[#allocation6 + $0x88] ss:$16 sps:$4 sm:$0xff]   ;;  %v2065_v27 = vld [vmem:[#allocation6 + $0xac] ss:$16 sps:$4 sm:$0xff]   ;;  %v2076_v28 = vld [vmem:[#allocation8 + $0x4] ss:$16 sps:$4 sm:$0xff]  }
  0x54   :  { %v2067_v30 = vld [vmem:[#allocation6 + $0xa8] ss:$16 sps:$4 sm:$0xff]   ;;  %v2074_v31 = vld [vmem:[#allocation8] ss:$16 sps:$4 sm:$0xff]   ;;  %v2068_v32 = vld [vmem:[#allocation6 + $0xcc] ss:$16 sps:$4 sm:$0xff]  }
  0x55   :  { %310 = vmatpush1.bf16.msra.mxu0 %v2033_v6  ;;  %353 = vmatpush1.bf16.msra.mxu1 %v2058_v18  ;;  %v2082_v33 = vld [vmem:[#allocation8 + $0x24] ss:$16 sps:$4 sm:$0xff]   ;;  %v2070_v34 = vld [vmem:[#allocation6 + $0xc8] ss:$16 sps:$4 sm:$0xff]   ;;  %v2080_v35 = vld [vmem:[#allocation8 + $0x20] ss:$16 sps:$4 sm:$0xff]  }
  0x56   :  { %311 = vmatprep.subr.bf16.mxu0 %v2034_v7  ;;  %354 = vmatprep.subr.bf16.mxu1 %v2059_v20  ;;  %v2071_v36 = vld [vmem:[#allocation6 + $0xec] ss:$16 sps:$4 sm:$0xff]   ;;  %v2088_v37 = vld [vmem:[#allocation8 + $0x44] ss:$16 sps:$4 sm:$0xff]   ;;  %v2073_v38 = vld [vmem:[#allocation6 + $0xe8] ss:$16 sps:$4 sm:$0xff]  }
  0x57   :  { %v2086_v39 = vld [vmem:[#allocation8 + $0x40] ss:$16 sps:$4 sm:$0xff]   ;;  %v2079_v40 = vld [vmem:[#allocation8 + $0xc] ss:$16 sps:$4 sm:$0xff]   ;;  %v2094_v41 = vld [vmem:[#allocation8 + $0x64] ss:$16 sps:$4 sm:$0xff]  }
  0x58   :  { %v2077_v42 = vld [vmem:[#allocation8 + $0x8] ss:$16 sps:$4 sm:$0xff]   ;;  %v2092_v43 = vld [vmem:[#allocation8 + $0x60] ss:$16 sps:$4 sm:$0xff]   ;;  %v2085_v44 = vld [vmem:[#allocation8 + $0x2c] ss:$16 sps:$4 sm:$0xff]  }
  0x59   :  { %312 = vmatpush1.bf16.msra.mxu0 %v2036_v8  ;;  %355 = vmatpush1.bf16.msra.mxu1 %v2061_v22  ;;  %v2100_v45 = vld [vmem:[#allocation8 + $0x84] ss:$16 sps:$4 sm:$0xff]   ;;  %v2083_v46 = vld [vmem:[#allocation8 + $0x28] ss:$16 sps:$4 sm:$0xff]   ;;  %v2098_v47 = vld [vmem:[#allocation8 + $0x80] ss:$16 sps:$4 sm:$0xff]  }
  0x5a   :  { %313 = vmatprep.subr.bf16.mxu0 %v2037_v9  ;;  %356 = vmatprep.subr.bf16.mxu1 %v2062_v24  ;;  %v2091_v48 = vld [vmem:[#allocation8 + $0x4c] ss:$16 sps:$4 sm:$0xff]   ;;  %v2106_v49 = vld [vmem:[#allocation8 + $0xa4] ss:$16 sps:$4 sm:$0xff]   ;;  %v2089_v50 = vld [vmem:[#allocation8 + $0x48] ss:$16 sps:$4 sm:$0xff]  }
  0x5b   :  { %v2104_v51 = vld [vmem:[#allocation8 + $0xa0] ss:$16 sps:$4 sm:$0xff]   ;;  %v2097_v52 = vld [vmem:[#allocation8 + $0x6c] ss:$16 sps:$4 sm:$0xff]   ;;  %v2112_v53 = vld [vmem:[#allocation8 + $0xc4] ss:$16 sps:$4 sm:$0xff]  }
  0x5c   :  { %v2095_v54 = vld [vmem:[#allocation8 + $0x68] ss:$16 sps:$4 sm:$0xff]   ;;  %v2110_v55 = vld [vmem:[#allocation8 + $0xc0] ss:$16 sps:$4 sm:$0xff]   ;;  %v2103_v56 = vld [vmem:[#allocation8 + $0x8c] ss:$16 sps:$4 sm:$0xff]  }
  0x5d   :  { %314 = vmatpush1.bf16.msra.mxu0 %v2039_v13  ;;  %357 = vmatpush1.bf16.msra.mxu1 %v2064_v26  ;;  %v2118_v57 = vld [vmem:[#allocation8 + $0xe4] ss:$16 sps:$4 sm:$0xff]   ;;  %v2101_v58 = vld [vmem:[#allocation8 + $0x88] ss:$16 sps:$4 sm:$0xff]   ;;  %v2109_v59 = vld [vmem:[#allocation8 + $0xac] ss:$16 sps:$4 sm:$0xff]  }
  0x5e   :  { %315 = vmatprep.subr.bf16.mxu0 %v2040_v15  ;;  %358 = vmatprep.subr.bf16.mxu1 %v2065_v27  ;;  %v2116_v60 = vld [vmem:[#allocation8 + $0xe0] ss:$16 sps:$4 sm:$0xff]   ;;  %v2124_v61 = vld [vmem:[#allocation8 + $0x104] ss:$16 sps:$4 sm:$0xff]   ;;  %v2107_v62 = vld [vmem:[#allocation8 + $0xa8] ss:$16 sps:$4 sm:$0xff]  }
  0x5f   :  { %v2122_v63 = vld [vmem:[#allocation8 + $0x100] ss:$16 sps:$4 sm:$0xff]   ;;  %v2115_v0 = vld [vmem:[#allocation8 + $0xcc] ss:$16 sps:$4 sm:$0xff]   ;;  %v2130_v1 = vld [vmem:[#allocation8 + $0x124] ss:$16 sps:$4 sm:$0xff]  }
  0x60   :  { %v2113_v2 = vld [vmem:[#allocation8 + $0xc8] ss:$16 sps:$4 sm:$0xff]   ;;  %v2128_v3 = vld [vmem:[#allocation8 + $0x120] ss:$16 sps:$4 sm:$0xff]   ;;  %v2121_v4 = vld [vmem:[#allocation8 + $0xec] ss:$16 sps:$4 sm:$0xff]  }
  0x61   :  { %316 = vmatpush1.bf16.msra.mxu0 %v2042_v17  ;;  %359 = vmatpush1.bf16.msra.mxu1 %v2067_v30  ;;  %v2136_v5 = vld [vmem:[#allocation8 + $0x144] ss:$16 sps:$4 sm:$0xff]   ;;  %v2119_v6 = vld [vmem:[#allocation8 + $0xe8] ss:$16 sps:$4 sm:$0xff]   ;;  %v2134_v7 = vld [vmem:[#allocation8 + $0x140] ss:$16 sps:$4 sm:$0xff]  }
  0x62   :  { %317 = vmatprep.subr.bf16.mxu0 %v2043_v19  ;;  %360 = vmatprep.subr.bf16.mxu1 %v2068_v32  ;;  %v2127_v8 = vld [vmem:[#allocation8 + $0x10c] ss:$16 sps:$4 sm:$0xff]   ;;  %v2142_v9 = vld [vmem:[#allocation8 + $0x164] ss:$16 sps:$4 sm:$0xff]   ;;  %v2125_v10 = vld [vmem:[#allocation8 + $0x108] ss:$16 sps:$4 sm:$0xff]  }
  0x63   :  { %v2140_v11 = vld [vmem:[#allocation8 + $0x160] ss:$16 sps:$4 sm:$0xff]   ;;  %v2133_v12 = vld [vmem:[#allocation8 + $0x12c] ss:$16 sps:$4 sm:$0xff]   ;;  %v2148_v13 = vld [vmem:[#allocation8 + $0x184] ss:$16 sps:$4 sm:$0xff]  }
  0x64   :  { %v2131_v14 = vld [vmem:[#allocation8 + $0x128] ss:$16 sps:$4 sm:$0xff]   ;;  %v2146_v15 = vld [vmem:[#allocation8 + $0x180] ss:$16 sps:$4 sm:$0xff]   ;;  %v2139_v16 = vld [vmem:[#allocation8 + $0x14c] ss:$16 sps:$4 sm:$0xff]  }
  0x65   :  { %318 = vmatpush1.bf16.msra.mxu0 %v2045_v21  ;;  %361 = vmatpush1.bf16.msra.mxu1 %v2070_v34  ;;  %v2154_v17 = vld [vmem:[#allocation8 + $0x1a4] ss:$16 sps:$4 sm:$0xff]   ;;  %v2137_v18 = vld [vmem:[#allocation8 + $0x148] ss:$16 sps:$4 sm:$0xff]   ;;  %v2152_v19 = vld [vmem:[#allocation8 + $0x1a0] ss:$16 sps:$4 sm:$0xff]  }
  0x66   :  { %319 = vmatprep.subr.bf16.mxu0 %v2046_v23  ;;  %362 = vmatprep.subr.bf16.mxu1 %v2071_v36  ;;  %v2145_v20 = vld [vmem:[#allocation8 + $0x16c] ss:$16 sps:$4 sm:$0xff]   ;;  %v2143_v21 = vld [vmem:[#allocation8 + $0x168] ss:$16 sps:$4 sm:$0xff]   ;;  %v2160_v26 = vld [vmem:[#allocation8 + $0x1c4] ss:$16 sps:$4 sm:$0xff]   ;;  %v119_v36 = vlaneseq }
  0x67   :  { %v2151_v22 = vld [vmem:[#allocation8 + $0x18c] ss:$16 sps:$4 sm:$0xff]   ;;  %v2149_v23 = vld [vmem:[#allocation8 + $0x188] ss:$16 sps:$4 sm:$0xff]   ;;  %v2166_v30 = vld [vmem:[#allocation8 + $0x1e4] ss:$16 sps:$4 sm:$0xff]  }
  0x68   :  { %v2157_v24 = vld [vmem:[#allocation8 + $0x1ac] ss:$16 sps:$4 sm:$0xff]   ;;  %v2164_v32 = vld [vmem:[#allocation8 + $0x1e0] ss:$16 sps:$4 sm:$0xff]   ;;  %v2172_v34 = vld [vmem:[#allocation8 + $0x204] ss:$16 sps:$4 sm:$0xff]  }
  0x69   :  { %320 = vmatpush1.bf16.msra.mxu0 %v2048_v25  ;;  %363 = vmatpush1.bf16.msra.mxu1 %v2073_v38  ;;  %v2155_v25 = vld [vmem:[#allocation8 + $0x1a8] ss:$16 sps:$4 sm:$0xff]   ;;  %v2163_v27 = vld [vmem:[#allocation8 + $0x1cc] ss:$16 sps:$4 sm:$0xff]   ;;  %s2425_s29 = smov [#allocation11]  }
  0x6a   :  { %1201 = vmatprep.subr.bf16.mxu0 %v2076_v28  ;;  %1287 = vmatprep.subr.bf16.mxu1 %v2079_v40  ;;  %v2158_v28 = vld [vmem:[#allocation8 + $0x1c0] ss:$16 sps:$4 sm:$0xff]   ;;  %s1745_s30 = sshll.u32 %s2425_s29, 4  ;;  %s1746_s30 = int_to_ptr.vmem [resolvable:$true] %s1745_s30 }
  0x6b   :  { %p2391_p5 = scmp.lt.s32.totalorder %s1746_s30, %s1746_s30 }
  0x6c   :  { %338 = vmatmul.mubr.bf16.vlgmr.msra.gmra.mrb[0].mxu0 %v2049_v29  ;;  %381 = vmatmul.mubr.bf16.vlgmr.msra.gmra.mrb[0].mxu1 %v2049_v29  ;;  %v2161_v29 = vld [vmem:[#allocation8 + $0x1c8] ss:$16 sps:$4 sm:$0xff]  }
  0x6d   :  { %1202 = vmatpush1.bf16.msra.mxu0 %v2074_v31  ;;  %1288 = vmatpush1.bf16.msra.mxu1 %v2077_v42  ;;  %v2169_v31 = vld [vmem:[#allocation8 + $0x1ec] ss:$16 sps:$4 sm:$0xff]  }
  0x6e   :  { %1203 = vmatprep.subr.bf16.mxu0 %v2082_v33  ;;  %1289 = vmatprep.subr.bf16.mxu1 %v2085_v44  ;;  %v2167_v33 = vld [vmem:[#allocation8 + $0x1e8] ss:$16 sps:$4 sm:$0xff]  }
  0x71   :  { %1204 = vmatpush1.bf16.msra.mxu0 %v2080_v35  ;;  %1290 = vmatpush1.bf16.msra.mxu1 %v2083_v46  ;;  %v2175_v35 = vld [vmem:[#allocation8 + $0x20c] ss:$16 sps:$4 sm:$0xff]  }
  0x72   :  { %1205 = vmatprep.subr.bf16.mxu0 %v2088_v37  ;;  %1291 = vmatprep.subr.bf16.mxu1 %v2091_v48  ;;  %v2535_v37 = vshrl.u32 %v119_v36, 7  ;;  %v2209_v36 = vld [vmem:[#allocation8 + $0x2c8] ss:$16 sps:$4 sm:$0xff]  }
  0x74   :  { %v121_v38 = vsub.s32 0, %v2535_v37  ;;  %v125_v40 = vsub.s32 1, %v2535_v37 }
  0x75   :  { %1206 = vmatpush1.bf16.msra.mxu0 %v2086_v39  ;;  %1292 = vmatpush1.bf16.msra.mxu1 %v2089_v50  ;;  %v117_v39 = vld [vmem:[%s2584_s2] sm:$0xf] }
  0x76   :  { %1207 = vmatprep.subr.bf16.mxu0 %v2094_v41  ;;  %1293 = vmatprep.subr.bf16.mxu1 %v2097_v52  ;;  %v122_v41 = vrot.slane %v117_v39, %v121_v38  ;;  %v126_v42 = vrot.slane %v117_v39, %v125_v40 }
  0x79   :  { %1208 = vmatpush1.bf16.msra.mxu0 %v2092_v43  ;;  %1294 = vmatpush1.bf16.msra.mxu1 %v2095_v54 }
  0x7a   :  { %1209 = vmatprep.subr.bf16.mxu0 %v2100_v45  ;;  %1295 = vmatprep.subr.bf16.mxu1 %v2103_v56  ;;  %v133_v56 = vsub.s32 3, %v2535_v37 }
  0x7d   :  { %1210 = vmatpush1.bf16.msra.mxu0 %v2098_v47  ;;  %1296 = vmatpush1.bf16.msra.mxu1 %v2101_v58 }
  0x7e   :  { %1211 = vmatprep.subr.bf16.mxu0 %v2106_v49  ;;  %1297 = vmatprep.subr.bf16.mxu1 %v2109_v59  ;;  %v2170_v59 = vld [vmem:[#allocation8 + $0x200] ss:$16 sps:$4 sm:$0xff]  }
  0x81   :  { %1212 = vmatpush1.bf16.msra.mxu0 %v2104_v51  ;;  %1298 = vmatpush1.bf16.msra.mxu1 %v2107_v62  ;;  %v2181_v62 = vld [vmem:[#allocation8 + $0x22c] ss:$16 sps:$4 sm:$0xff]  }
  0x82   :  { %1213 = vmatprep.subr.bf16.mxu0 %v2112_v53  ;;  %1299 = vmatprep.subr.bf16.mxu1 %v2115_v0  ;;  %v129_v53 = vsub.s32 2, %v2535_v37  ;;  %v134_v0 = vrot.slane %v117_v39, %v133_v56 }
  0x85   :  { %1214 = vmatpush1.bf16.msra.mxu0 %v2110_v55  ;;  %1300 = vmatpush1.bf16.msra.mxu1 %v2113_v2  ;;  %v2179_v2 = vld [vmem:[#allocation8 + $0x228] ss:$16 sps:$4 sm:$0xff]  }
  0x86   :  { %1215 = vmatprep.subr.bf16.mxu0 %v2118_v57  ;;  %1301 = vmatprep.subr.bf16.mxu1 %v2121_v4  ;;  %v2184_v4 = vld [vmem:[#allocation8 + $0x244] ss:$16 sps:$4 sm:$0xff]  }
  0x89   :  { %1216 = vmatpush1.bf16.msra.mxu0 %v2116_v60  ;;  %1302 = vmatpush1.bf16.msra.mxu1 %v2119_v6  ;;  %v2173_v60 = vld [vmem:[#allocation8 + $0x208] ss:$16 sps:$4 sm:$0xff]  }
  0x8a   :  { %1217 = vmatprep.subr.bf16.mxu0 %v2124_v61  ;;  %1303 = vmatprep.subr.bf16.mxu1 %v2127_v8  ;;  %v2178_v61 = vld [vmem:[#allocation8 + $0x224] ss:$16 sps:$4 sm:$0xff]  }
  0x8d   :  { %1218 = vmatpush1.bf16.msra.mxu0 %v2122_v63  ;;  %1304 = vmatpush1.bf16.msra.mxu1 %v2125_v10  ;;  %v130_v63 = vrot.slane %v117_v39, %v129_v53  ;;  %v2214_v39 = vld [vmem:[#allocation8 + $0x2e4] ss:$16 sps:$4 sm:$0xff]  }
  0x8e   :  { %1219 = vmatprep.subr.bf16.mxu0 %v2130_v1  ;;  %1305 = vmatprep.subr.bf16.mxu1 %v2133_v12  ;;  %v2176_v1 = vld [vmem:[#allocation8 + $0x220] ss:$16 sps:$4 sm:$0xff]  }
  0x91   :  { %1220 = vmatpush1.bf16.msra.mxu0 %v2128_v3  ;;  %1306 = vmatpush1.bf16.msra.mxu1 %v2131_v14  ;;  %v2185_v14 = vld [vmem:[#allocation8 + $0x248] ss:$16 sps:$4 sm:$0xff]  }
  0x92   :  { %1221 = vmatprep.subr.bf16.mxu0 %v2136_v5  ;;  %1307 = vmatprep.subr.bf16.mxu1 %v2139_v16  ;;  %v2187_v5 = vld [vmem:[#allocation8 + $0x24c] ss:$16 sps:$4 sm:$0xff]  }
  0x95   :  { %1222 = vmatpush1.bf16.msra.mxu0 %v2134_v7  ;;  %1308 = vmatpush1.bf16.msra.mxu1 %v2137_v18  ;;  %v2193_v18 = vld [vmem:[#allocation8 + $0x26c] ss:$16 sps:$4 sm:$0xff]  }
  0x96   :  { %1223 = vmatprep.subr.bf16.mxu0 %v2142_v9  ;;  %1309 = vmatprep.subr.bf16.mxu1 %v2145_v20 }
  0x99   :  { %1224 = vmatpush1.bf16.msra.mxu0 %v2140_v11  ;;  %1310 = vmatpush1.bf16.msra.mxu1 %v2143_v21 }
  0x9a   :  { %1225 = vmatprep.subr.bf16.mxu0 %v2148_v13  ;;  %1311 = vmatprep.subr.bf16.mxu1 %v2151_v22  ;;  %v2182_v13 = vld [vmem:[#allocation8 + $0x240] ss:$16 sps:$4 sm:$0xff]  }
  0x9b   :  { %v2188_v22 = vld [vmem:[#allocation8 + $0x260] ss:$16 sps:$4 sm:$0xff]  }
  0x9d   :  { %1226 = vmatpush1.bf16.msra.mxu0 %v2146_v15  ;;  %1312 = vmatpush1.bf16.msra.mxu1 %v2149_v23  ;;  %v2191_v23 = vld [vmem:[#allocation8 + $0x268] ss:$16 sps:$4 sm:$0xff]  }
  0x9e   :  { %1227 = vmatprep.subr.bf16.mxu0 %v2154_v17  ;;  %1313 = vmatprep.subr.bf16.mxu1 %v2157_v24  ;;  %v2190_v17 = vld [vmem:[#allocation8 + $0x264] ss:$16 sps:$4 sm:$0xff]  }
  0xa1   :  { %1228 = vmatpush1.bf16.msra.mxu0 %v2152_v19  ;;  %1314 = vmatpush1.bf16.msra.mxu1 %v2155_v25  ;;  %v2196_v25 = vld [vmem:[#allocation8 + $0x284] ss:$16 sps:$4 sm:$0xff]  }
  0xa2   :  { %1229 = vmatprep.subr.bf16.mxu0 %v2160_v26  ;;  %1315 = vmatprep.subr.bf16.mxu1 %v2163_v27  ;;  %v2199_v26 = vld [vmem:[#allocation8 + $0x28c] ss:$16 sps:$4 sm:$0xff]   ;;  %v2194_v27 = vld [vmem:[#allocation8 + $0x280] ss:$16 sps:$4 sm:$0xff]  }
  0xa5   :  { %1230 = vmatpush1.bf16.msra.mxu0 %v2158_v28  ;;  %1316 = vmatpush1.bf16.msra.mxu1 %v2161_v29  ;;  %v2197_v28 = vld [vmem:[#allocation8 + $0x288] ss:$16 sps:$4 sm:$0xff]   ;;  %v2202_v29 = vld [vmem:[#allocation8 + $0x2a4] ss:$16 sps:$4 sm:$0xff]  }
  0xa6   :  { %1231 = vmatprep.subr.bf16.mxu0 %v2166_v30  ;;  %1317 = vmatprep.subr.bf16.mxu1 %v2169_v31  ;;  %v2205_v30 = vld [vmem:[#allocation8 + $0x2ac] ss:$16 sps:$4 sm:$0xff]   ;;  %v2200_v31 = vld [vmem:[#allocation8 + $0x2a0] ss:$16 sps:$4 sm:$0xff]  }
  0xa9   :  { %1232 = vmatpush1.bf16.msra.mxu0 %v2164_v32  ;;  %1318 = vmatpush1.bf16.msra.mxu1 %v2167_v33  ;;  %v2203_v32 = vld [vmem:[#allocation8 + $0x2a8] ss:$16 sps:$4 sm:$0xff]   ;;  %v2208_v33 = vld [vmem:[#allocation8 + $0x2c4] ss:$16 sps:$4 sm:$0xff]  }
  0xaa   :  { %1244 = vmatprep.subr.bf16.mxu0 %v2172_v34  ;;  %1330 = vmatprep.subr.bf16.mxu1 %v2175_v35  ;;  %v2211_v34 = vld [vmem:[#allocation8 + $0x2cc] ss:$16 sps:$4 sm:$0xff]   ;;  %v2206_v35 = vld [vmem:[#allocation8 + $0x2c0] ss:$16 sps:$4 sm:$0xff]  }
 0x13f   :  { %v339_v43 = vpop.f32.mrb[0].mxu0  ;;  %v382_v3 = vpop.f32.mrb[0].mxu1 }
 0x140   :  { %v340_v44 = vadd.f32 %v339_v43, %v122_v41  ;;  %v341_v45 = vpop.f32.mrb[1].mxu0  ;;  %v383_v6 = vadd.f32 %v382_v3, %v130_v63  ;;  %v384_v7 = vpop.f32.mrb[1].mxu1  ;;  %v2215_v43 = vld [vmem:[#allocation8 + $0x2e8] ss:$16 sps:$4 sm:$0xff]   ;;  %v2253_v3 = vld [vmem:[#allocation8 + $0x3ac] ss:$16 sps:$4 sm:$0xff]  }
 0x141   :  { %v342_v46 = vadd.f32 %v341_v45, %v126_v42  ;;  %v343_v47 = vpop.f32.mrb[2].mxu0  ;;  %v385_v8 = vadd.f32 %v384_v7, %v134_v0  ;;  %v386_v9 = vpop.f32.mrb[2].mxu1  ;;  %v2223_v45 = vld [vmem:[#allocation8 + $0x30c] ss:$16 sps:$4 sm:$0xff]  }
 0x142   :  { %v344_v48 = vadd.f32 %v343_v47, %v122_v41  ;;  %v345_v49 = vpop.f32.mrb[3].mxu0  ;;  %v391_v51 = vmax.f32 %v340_v44, 0.0  ;;  %v393_v10 = vmax.f32 %v383_v6, 0.0  ;;  %v387_v11 = vadd.f32 %v386_v9, %v130_v63  ;;  %v388_v12 = vpop.f32.mrb[3].mxu1  ;;  %v2217_v41 = vld [vmem:[#allocation8 + $0x2ec] ss:$16 sps:$4 sm:$0xff]  }
 0x143   :  { %v346_v50 = vadd.f32 %v345_v49, %v126_v42  ;;  %v392_v54 = vmax.f32 %v342_v46, 0.0  ;;  %v394_v15 = vmax.f32 %v385_v8, 0.0  ;;  %v389_v16 = vadd.f32 %v388_v12, %v134_v0  ;;  %v2212_v42 = vld [vmem:[#allocation8 + $0x2e0] ss:$16 sps:$4 sm:$0xff]   ;;  %v2220_v44 = vld [vmem:[#allocation8 + $0x304] ss:$16 sps:$4 sm:$0xff]  }
 0x144   :  { %v395_v52 = vmax.f32 %v344_v48, 0.0  ;;  %v397_v19 = vmax.f32 %v387_v11, 0.0  ;;  %v2218_v46 = vld [vmem:[#allocation8 + $0x300] ss:$16 sps:$4 sm:$0xff]   ;;  %v2221_v47 = vld [vmem:[#allocation8 + $0x308] ss:$16 sps:$4 sm:$0xff]  }
 0x145   :  { %v396_v55 = vmax.f32 %v346_v50, 0.0  ;;  %v398_v20 = vmax.f32 %v389_v16, 0.0  ;;  %v2226_v48 = vld [vmem:[#allocation8 + $0x324] ss:$16 sps:$4 sm:$0xff]   ;;  %v2229_v49 = vld [vmem:[#allocation8 + $0x32c] ss:$16 sps:$4 sm:$0xff]  }
 0x146   :  { %v399_v57 = vpack.c.bf16 %v395_v52, %v391_v51  ;;  %v2552_v21 = vpack.c.bf16 %v397_v19, %v393_v10  ;;  %v2224_v50 = vld [vmem:[#allocation8 + $0x320] ss:$16 sps:$4 sm:$0xff]   ;;  %v2227_v51 = vld [vmem:[#allocation8 + $0x328] ss:$16 sps:$4 sm:$0xff]   ;;  %v2232_v52 = vld [vmem:[#allocation8 + $0x344] ss:$16 sps:$4 sm:$0xff]  }
 0x147   :  { %v400_v58 = vpack.c.bf16 %v396_v55, %v392_v54  ;;  %v402_v24 = vpack.c.bf16 %v398_v20, %v394_v15  ;;  %v2235_v54 = vld [vmem:[#allocation8 + $0x34c] ss:$16 sps:$4 sm:$0xff]   ;;  %v2230_v55 = vld [vmem:[#allocation8 + $0x340] ss:$16 sps:$4 sm:$0xff]   ;;  %v2256_v6 = vld [vmem:[#allocation8 + $0x3c4] ss:$16 sps:$4 sm:$0xff]  }
 0x148   :  { %v2247_v63 = vld [vmem:[#allocation8 + $0x38c] ss:$16 sps:$4 sm:$0xff]   ;;  %v2242_v0 = vld [vmem:[#allocation8 + $0x380] ss:$16 sps:$4 sm:$0xff]   ;;  %v2257_v9 = vld [vmem:[#allocation8 + $0x3c8] ss:$16 sps:$4 sm:$0xff]  }
 0x149   :  { %1233 = vmatprep.mubr.bf16.mxu0 %v400_v58  ;;  %1319 = vmatprep.mubr.bf16.mxu1 %v400_v58  ;;  %v2238_v58 = vld [vmem:[#allocation8 + $0x364] ss:$16 sps:$4 sm:$0xff]   ;;  %v2259_v7 = vld [vmem:[#allocation8 + $0x3cc] ss:$16 sps:$4 sm:$0xff]   ;;  %v2254_v8 = vld [vmem:[#allocation8 + $0x3c0] ss:$16 sps:$4 sm:$0xff]  }
 0x14a   :  { %1234 = vmatmul.mubr.bf16.vlgmr.msra.gmra.mrb[4].mxu0 %v399_v57  ;;  %1320 = vmatmul.mubr.bf16.vlgmr.msra.gmra.mrb[4].mxu1 %v399_v57  ;;  %v2233_v57 = vld [vmem:[#allocation8 + $0x348] ss:$16 sps:$4 sm:$0xff]   ;;  %v2262_v10 = vld [vmem:[#allocation8 + $0x3e4] ss:$16 sps:$4 sm:$0xff]   ;;  %v2265_v11 = vld [vmem:[#allocation8 + $0x3ec] ss:$16 sps:$4 sm:$0xff]  }
 0x14b   :  { %1245 = vmatpush1.bf16.msra.mxu0 %v2170_v59  ;;  %1331 = vmatpush1.bf16.msra.mxu1 %v2173_v60  ;;  %v2241_v59 = vld [vmem:[#allocation8 + $0x36c] ss:$16 sps:$4 sm:$0xff]   ;;  %v2236_v60 = vld [vmem:[#allocation8 + $0x360] ss:$16 sps:$4 sm:$0xff]  }
 0x14c   :  { %1246 = vmatprep.subr.bf16.mxu0 %v2178_v61  ;;  %1332 = vmatprep.subr.bf16.mxu1 %v2181_v62  ;;  %v2239_v61 = vld [vmem:[#allocation8 + $0x368] ss:$16 sps:$4 sm:$0xff]   ;;  %v2244_v62 = vld [vmem:[#allocation8 + $0x384] ss:$16 sps:$4 sm:$0xff]   ;;  %v2260_v12 = vld [vmem:[#allocation8 + $0x3e0] ss:$16 sps:$4 sm:$0xff]  }
 0x14d   :  { %1276 = vmatprep.mubr.bf16.mxu0 %v402_v24  ;;  %1362 = vmatprep.mubr.bf16.mxu1 %v402_v24  ;;  %v2267_v15 = vld [vmem:[#allocation9 + $0xc0] sm:$0xff]   ;;  %v2271_v19 = vld [vmem:[#allocation9 + $0xc8] sm:$0xff]   ;;  %v2275_v24 = vld [vmem:[#allocation9 + $0xd0] sm:$0xff]  }
 0x14e   :  { %v2268_v16 = vld [vmem:[#allocation9] sm:$0xff]   ;;  %v2272_v20 = vld [vmem:[#allocation9 + $0x8] sm:$0xff]  }
 0x14f   :  { %1247 = vmatpush1.bf16.msra.mxu0 %v2176_v1  ;;  %1333 = vmatpush1.bf16.msra.mxu1 %v2179_v2  ;;  %v2245_v1 = vld [vmem:[#allocation8 + $0x388] ss:$16 sps:$4 sm:$0xff]   ;;  %v2250_v2 = vld [vmem:[#allocation8 + $0x3a4] ss:$16 sps:$4 sm:$0xff]  }
 0x150   :  { %1248 = vmatprep.subr.bf16.mxu0 %v2184_v4  ;;  %1334 = vmatprep.subr.bf16.mxu1 %v2187_v5  ;;  %v2248_v4 = vld [vmem:[#allocation8 + $0x3a0] ss:$16 sps:$4 sm:$0xff]   ;;  %v2251_v5 = vld [vmem:[#allocation8 + $0x3a8] ss:$16 sps:$4 sm:$0xff]  }
 0x153   :  { %1249 = vmatpush1.bf16.msra.mxu0 %v2182_v13  ;;  %1335 = vmatpush1.bf16.msra.mxu1 %v2185_v14  ;;  %v2263_v13 = vld [vmem:[#allocation8 + $0x3e8] ss:$16 sps:$4 sm:$0xff]   ;;  %v2266_v14 = vld [vmem:[#allocation9 + $0x40] sm:$0xff]  }
 0x154   :  { %1250 = vmatprep.subr.bf16.mxu0 %v2190_v17  ;;  %1336 = vmatprep.subr.bf16.mxu1 %v2193_v18  ;;  %v2269_v17 = vld [vmem:[#allocation9 + $0x80] sm:$0xff]   ;;  %v2270_v18 = vld [vmem:[#allocation9 + $0x48] sm:$0xff]  }
 0x157   :  { %1251 = vmatpush1.bf16.msra.mxu0 %v2188_v22  ;;  %1337 = vmatpush1.bf16.msra.mxu1 %v2191_v23  ;;  %v2273_v22 = vld [vmem:[#allocation9 + $0x88] sm:$0xff]   ;;  %v2274_v23 = vld [vmem:[#allocation9 + $0x50] sm:$0xff]  }
 0x158   :  { %1252 = vmatprep.subr.bf16.mxu0 %v2196_v25  ;;  %1338 = vmatprep.subr.bf16.mxu1 %v2199_v26  ;;  %v2276_v25 = vld [vmem:[#allocation9 + $0x10] sm:$0xff]  }
 0x159   :  { %v2277_v26 = vld [vmem:[#allocation9 + $0x90] sm:$0xff]  }
 0x15b   :  { %1253 = vmatpush1.bf16.msra.mxu0 %v2194_v27  ;;  %1339 = vmatpush1.bf16.msra.mxu1 %v2197_v28  ;;  %v2278_v27 = vld [vmem:[#allocation9 + $0x58] sm:$0xff]  }
 0x15c   :  { %1254 = vmatprep.subr.bf16.mxu0 %v2202_v29  ;;  %1340 = vmatprep.subr.bf16.mxu1 %v2205_v30  ;;  %v2279_v28 = vld [vmem:[#allocation9 + $0xd8] sm:$0xff]   ;;  %v2282_v30 = vld [vmem:[#allocation9 + $0x60] sm:$0xff]  }
 0x15d   :  { %v2280_v29 = vld [vmem:[#allocation9 + $0x18] sm:$0xff]  }
 0x15f   :  { %1255 = vmatpush1.bf16.msra.mxu0 %v2200_v31  ;;  %1341 = vmatpush1.bf16.msra.mxu1 %v2203_v32  ;;  %v2283_v31 = vld [vmem:[#allocation9 + $0xe0] sm:$0xff]  }
 0x160   :  { %1256 = vmatprep.subr.bf16.mxu0 %v2208_v33  ;;  %1342 = vmatprep.subr.bf16.mxu1 %v2211_v34  ;;  %v2284_v32 = vld [vmem:[#allocation9 + $0x20] sm:$0xff]   ;;  %v2286_v34 = vld [vmem:[#allocation9 + $0x68] sm:$0xff]  }
 0x161   :  { %v2285_v33 = vld [vmem:[#allocation9 + $0xa0] sm:$0xff]  }
 0x163   :  { %1257 = vmatpush1.bf16.msra.mxu0 %v2206_v35  ;;  %1343 = vmatpush1.bf16.msra.mxu1 %v2209_v36  ;;  %v2287_v35 = vld [vmem:[#allocation9 + $0xe8] sm:$0xff]  }
 0x164   :  { %1258 = vmatprep.subr.bf16.mxu0 %v2214_v39  ;;  %1344 = vmatprep.subr.bf16.mxu1 %v2217_v41  ;;  %v2288_v36 = vld [vmem:[#allocation9 + $0x28] sm:$0xff]   ;;  %v2290_v41 = vld [vmem:[#allocation9 + $0x70] sm:$0xff]  }
 0x165   :  { %v2289_v39 = vld [vmem:[#allocation9 + $0xa8] sm:$0xff]  }
 0x167   :  { %1259 = vmatpush1.bf16.msra.mxu0 %v2212_v42  ;;  %1345 = vmatpush1.bf16.msra.mxu1 %v2215_v43  ;;  %v2291_v42 = vld [vmem:[#allocation9 + $0xf0] sm:$0xff]  }
 0x168   :  { %1260 = vmatprep.subr.bf16.mxu0 %v2220_v44  ;;  %1346 = vmatprep.subr.bf16.mxu1 %v2223_v45  ;;  %v2292_v43 = vld [vmem:[#allocation9 + $0x30] sm:$0xff]   ;;  %v2294_v45 = vld [vmem:[#allocation9 + $0x78] sm:$0xff]  }
 0x169   :  { %v2293_v44 = vld [vmem:[#allocation9 + $0xb0] sm:$0xff]  }
 0x16b   :  { %1261 = vmatpush1.bf16.msra.mxu0 %v2218_v46  ;;  %1347 = vmatpush1.bf16.msra.mxu1 %v2221_v47  ;;  %v2295_v46 = vld [vmem:[#allocation9 + $0xf8] sm:$0xff]  }
 0x16c   :  { %1262 = vmatprep.subr.bf16.mxu0 %v2226_v48  ;;  %1348 = vmatprep.subr.bf16.mxu1 %v2229_v49  ;;  %v2296_v47 = vld [vmem:[#allocation9 + $0x38] sm:$0xff]  }
 0x16d   :  { %v2297_v48 = vld [vmem:[#allocation9 + $0xb8] sm:$0xff]  }
 0x16e   :  { %v539_v49 = vld [vmem:[%s2586_s4] sm:$0xf] }
 0x16f   :  { %1263 = vmatpush1.bf16.msra.mxu0 %v2224_v50  ;;  %1349 = vmatpush1.bf16.msra.mxu1 %v2227_v51  ;;  %v544_v50 = vrot.slane %v539_v49, %v121_v38  ;;  %v552_v51 = vrot.slane %v539_v49, %v129_v53 }
 0x170   :  { %1264 = vmatprep.subr.bf16.mxu0 %v2232_v52  ;;  %1350 = vmatprep.subr.bf16.mxu1 %v2235_v54  ;;  %v548_v52 = vrot.slane %v539_v49, %v125_v40  ;;  %v556_v54 = vrot.slane %v539_v49, %v133_v56 }
 0x173   :  { %1265 = vmatpush1.bf16.msra.mxu0 %v2230_v55  ;;  %1351 = vmatpush1.bf16.msra.mxu1 %v2233_v57 }
 0x174   :  { %1266 = vmatprep.subr.bf16.mxu0 %v2238_v58  ;;  %1352 = vmatprep.subr.bf16.mxu1 %v2241_v59 }
 0x177   :  { %1267 = vmatpush1.bf16.msra.mxu0 %v2236_v60  ;;  %1353 = vmatpush1.bf16.msra.mxu1 %v2239_v61 }
 0x178   :  { %1268 = vmatprep.subr.bf16.mxu0 %v2244_v62  ;;  %1354 = vmatprep.subr.bf16.mxu1 %v2247_v63 }
 0x17b   :  { %1269 = vmatpush1.bf16.msra.mxu0 %v2242_v0  ;;  %1355 = vmatpush1.bf16.msra.mxu1 %v2245_v1 }
 0x17c   :  { %1270 = vmatprep.subr.bf16.mxu0 %v2250_v2  ;;  %1356 = vmatprep.subr.bf16.mxu1 %v2253_v3 }
 0x17f   :  { %1271 = vmatpush1.bf16.msra.mxu0 %v2248_v4  ;;  %1357 = vmatpush1.bf16.msra.mxu1 %v2251_v5 }
 0x180   :  { %1272 = vmatprep.subr.bf16.mxu0 %v2256_v6  ;;  %1358 = vmatprep.subr.bf16.mxu1 %v2259_v7 }
 0x183   :  { %1273 = vmatpush1.bf16.msra.mxu0 %v2254_v8  ;;  %1359 = vmatpush1.bf16.msra.mxu1 %v2257_v9 }
 0x184   :  { %1274 = vmatprep.subr.bf16.mxu0 %v2262_v10  ;;  %1360 = vmatprep.subr.bf16.mxu1 %v2265_v11 }
 0x187   :  { %1275 = vmatpush1.bf16.msra.mxu0 %v2260_v12  ;;  %1361 = vmatpush1.bf16.msra.mxu1 %v2263_v13 }
 0x188   :  { %1953 = vmatprep.subr.bf16.mxu0 %v2266_v14  ;;  %1975 = vmatprep.subr.bf16.mxu1 %v2267_v15 }
 0x18a   :  { %1277 = vmatmul.mubr.bf16.vlgmr.msra.gmra.mrb[4].mxu0 %v2552_v21  ;;  %1363 = vmatmul.mubr.bf16.vlgmr.msra.gmra.mrb[4].mxu1 %v2552_v21  ;;  %v2281_v21 = vld [vmem:[#allocation9 + $0x98] sm:$0xff]  }
 0x18b   :  { %1954 = vmatpush3.bf16.msra.mxu0 %v2268_v16  ;;  %1976 = vmatpush3.bf16.msra.mxu1 %v2269_v17  ;;  %v1920_v17 = vld [vmem:[%s2588_s6] ss:$0 sm:$0xff]  ;;  %s2386_s6 = scalar_lea.vmem %s1746_s30, 256 }
 0x18c   :  { %1955 = vmatprep.subr.bf16.mxu0 %v2270_v18  ;;  %1977 = vmatprep.subr.bf16.mxu1 %v2271_v19  ;;  %p2387_p4 = scmp.ne.s32.totalorder %s1746_s30, %s2386_s6  ;;  %p2392_p6 = scmp.lt.s32.totalorder %s2386_s6, %s2386_s6 }
 0x18e   :  { %p2393_p7 = por %p2392_p6, %p2391_p5 }
 0x18f   :  { %1956 = vmatpush3.bf16.msra.mxu0 %v2272_v20  ;;  %1978 = vmatpush3.bf16.msra.mxu1 %v2273_v22 }
 0x190   :  { %1957 = vmatprep.subr.bf16.mxu0 %v2274_v23  ;;  %1979 = vmatprep.subr.bf16.mxu1 %v2275_v24  ;;  %p2394_p8 = pnand %p2393_p7, %p2387_p4 }
 0x193   :  { %1958 = vmatpush3.bf16.msra.mxu0 %v2276_v25  ;;  %1980 = vmatpush3.bf16.msra.mxu1 %v2277_v26 }
 0x194   :  { %1959 = vmatprep.subr.bf16.mxu0 %v2278_v27  ;;  %1981 = vmatprep.subr.bf16.mxu1 %v2279_v28 }
 0x197   :  { %1960 = vmatpush3.bf16.msra.mxu0 %v2280_v29  ;;  %1982 = vmatpush3.bf16.msra.mxu1 %v2281_v21 }
 0x198   :  { %1961 = vmatprep.subr.bf16.mxu0 %v2282_v30  ;;  %1983 = vmatprep.subr.bf16.mxu1 %v2283_v31 }
 0x19b   :  { %1962 = vmatpush3.bf16.msra.mxu0 %v2284_v32  ;;  %1984 = vmatpush3.bf16.msra.mxu1 %v2285_v33 }
 0x19c   :  { %1963 = vmatprep.subr.bf16.mxu0 %v2286_v34  ;;  %1985 = vmatprep.subr.bf16.mxu1 %v2287_v35 }
 0x19f   :  { %1964 = vmatpush3.bf16.msra.mxu0 %v2288_v36  ;;  %1986 = vmatpush3.bf16.msra.mxu1 %v2289_v39 }
 0x1a0   :  { %1965 = vmatprep.subr.bf16.mxu0 %v2290_v41  ;;  %1987 = vmatprep.subr.bf16.mxu1 %v2291_v42 }
 0x1a3   :  { %1966 = vmatpush3.bf16.msra.mxu0 %v2292_v43  ;;  %1988 = vmatpush3.bf16.msra.mxu1 %v2293_v44 }
 0x1a4   :  { %1967 = vmatprep.subr.bf16.mxu0 %v2294_v45  ;;  %1989 = vmatprep.subr.bf16.mxu1 %v2295_v46 }
 0x1a7   :  { %1968 = vmatpush3.bf16.msra.mxu0 %v2296_v47  ;;  %1990 = vmatpush3.bf16.msra.mxu1 %v2297_v48 }
 0x25d   :  { %v1278_v55 = vpop.f32.mrb[4].mxu0  ;;  %v1364_v57 = vpop.f32.mrb[4].mxu1 }
 0x25e   :  { %v1997_v58 = vadd.f32 %v1278_v55, %v544_v50  ;;  %v2001_v59 = vadd.f32 %v1364_v57, %v552_v51  ;;  %v1280_v60 = vpop.f32.mrb[5].mxu0  ;;  %v1366_v61 = vpop.f32.mrb[5].mxu1 }
 0x25f   :  { %v1998_v62 = vadd.f32 %v1280_v60, %v548_v52  ;;  %v2002_v63 = vadd.f32 %v1366_v61, %v556_v54  ;;  %v1282_v0 = vpop.f32.mrb[6].mxu0  ;;  %v1368_v1 = vpop.f32.mrb[6].mxu1 }
 0x260   :  { %v1999_v38 = vadd.f32 %v1282_v0, %v544_v50  ;;  %v2003_v2 = vadd.f32 %v1368_v1, %v552_v51  ;;  %v1284_v3 = vpop.f32.mrb[7].mxu0  ;;  %v1370_v53 = vpop.f32.mrb[7].mxu1  ;;  %v1373_v40 = vmax.f32 %v1997_v58, 0.0  ;;  %v1375_v6 = vmax.f32 %v2001_v59, 0.0 }
 0x261   :  { %v2000_v4 = vadd.f32 %v1284_v3, %v548_v52  ;;  %v2004_v5 = vadd.f32 %v1370_v53, %v556_v54  ;;  %v1374_v7 = vmax.f32 %v1998_v62, 0.0  ;;  %v1376_v8 = vmax.f32 %v2002_v63, 0.0 }
 0x262   :  { %v1377_v37 = vmax.f32 %v1999_v38, 0.0  ;;  %v1379_v56 = vmax.f32 %v2003_v2, 0.0 }
 0x263   :  { %v1378_v9 = vmax.f32 %v2000_v4, 0.0  ;;  %v1380_v10 = vmax.f32 %v2004_v5, 0.0 }
 0x264   :  { %v1381_v11 = vpack.c.bf16 %v1377_v37, %v1373_v40  ;;  %v1383_v12 = vpack.c.bf16 %v1379_v56, %v1375_v6 }
 0x265   :  { %v1382_v13 = vpack.c.bf16 %v1378_v9, %v1374_v7  ;;  %v1384_v14 = vpack.c.bf16 %v1380_v10, %v1376_v8 }
 0x267   :  { %1688 = vmatprep.mubr.bf16.mxu0 %v1382_v13  ;;  %1729 = vmatprep.mubr.bf16.mxu1 %v1384_v14 }
 0x268   :  { %1689 = vmatmul.mubr.bf16.vlgmr.msra.gmra.mrb[8].mxu0 %v1381_v11  ;;  %1730 = vmatmul.mubr.bf16.vlgmr.msra.gmra.mrb[8].mxu1 %v1383_v12 }
 0x33b   :  { %v1969_v15 = vpop.f32.mrb[8].mxu0  ;;  %v1991_v16 = vpop.f32.mrb[8].mxu1 }
 0x33c   :  { %v1970_v18 = vpop.f32.mrb[9].mxu0  ;;  %v1992_v19 = vpop.f32.mrb[9].mxu1 }
 0x33d   :  { %v1971_v20 = vadd.f32 %v1970_v18, %v1969_v15  ;;  %v1993_v22 = vadd.f32 %v1992_v19, %v1991_v16  ;;  %v1972_v23 = vpop.f32.mrb[10].mxu0  ;;  %v1994_v24 = vpop.f32.mrb[10].mxu1 }
 0x33e   :  { %v1973_v25 = vpop.f32.mrb[11].mxu0  ;;  %v1995_v26 = vpop.f32.mrb[11].mxu1 }
 0x33f   :  { %v1691_v27 = vadd.f32 %v1971_v20, %v1920_v17  ;;  %v1974_v28 = vadd.f32 %v1973_v25, %v1972_v23  ;;  %v1996_v29 = vadd.f32 %v1995_v26, %v1994_v24 }
 0x341   :  { %v1732_v21 = vadd.f32 %v1993_v22, %v1691_v27  ;;  %v1694_v30 = vadd.f32 %v1974_v28, %v1920_v17 }
 0x343   :  { %1738 = vst [vmem:[#allocation11] sm:$0xff] %v1732_v21  ;;  %v1735_v31 = vadd.f32 %v1996_v29, %v1694_v30 }
 0x345   :  { %1739 = vst [vmem:[#allocation11 + $0x8] sm:$0xff] %v1735_v31 }
 0x346   :  { %2397 = shalt.err (!%p2394_p8)
}
 0x347   :  { %s2398_s10 = scalar_lea.hbm %s2589_s7, 256 }
 0x348   :  { %p2399_p9 = scmp.ne.s32.totalorder %s2589_s7, %s2398_s10  ;;  %p2402_p10 = scmp.lt.u32.totalorder %s2398_s10, %s2589_s7 }
 0x34a   :  { %p2404_p11 = pnand %p2402_p10, %p2399_p9 }
 0x34c   :  { %2407 = shalt.err (!%p2404_p11)
}
 0x34d   :  { %s2426_s18 = smov 128   ;;  %s2427_s0 = smov 8  }
 0x34e   :  { %1751 = dma.vmem_to_hbm [thread:$0]  %s1746_s30, 256, %s2589_s7, [#allocation5], %s2426_s18, %s2426_s18, %s2427_s0  }
 0x34f   :  { %2414 = dma.done.wait [#allocation5], 256  }
 0x350   :  { %2415 = vsyncadd [#allocation5], 4294967040 }
 0x351   :  { %1755 = vsyncpa [#allocation4], 1 }
 0x352   :  { %1756 = vsyncpa [#allocation7], 1 }
 0x353   :  { %1757 = vsyncpa [#allocation10], 1 }
 0x354   :  { %1758 = vsyncpa [#allocation5], 1 }

// kernel: tpu_custom_call.1
= control target key start
LH: loop header
LB: loop body
LE: loop exit
PB: predicated region body
PF: predicated region fallthrough
CT: control target
= control target key end

     0   :  { %12 = vsyncpa [#allocation4], 0  ;;  %s2582_s0 = inlined_call_operand.hbm [shape: bf16[16,128], index: 0, kind: input, shape index: {}]   ;;  %s2583_s1 = inlined_call_operand.hbm [shape: bf16[128,512], index: 1, kind: input, shape index: {}]   ;;  %s2584_s2 = inlined_call_operand.vmem [shape: f32[1,512], index: 2, kind: input, shape index: {}]   ;;  %s2585_s3 = inlined_call_operand.hbm [shape: bf16[512,512], index: 3, kind: input, shape index: {}]   ;;  %s2586_s4 = inlined_call_operand.vmem [shape: f32[1,512], index: 4, kind: input, shape index: {}]   ;;  %s2587_s5 = inlined_call_operand.hbm [shape: bf16[512,128], index: 5, kind: input, shape index: {}]   ;;  %s2588_s6 = inlined_call_operand.vmem [shape: f32[1,128], index: 6, kind: input, shape index: {}]   ;;  %s2589_s7 = inlined_call_operand.hbm [shape: f32[16,128], index: 7, kind: output, shape index: {}]  }
   0x1   :  { %13 = vsyncpa [#allocation7], 0 }
   0x2   :  { %14 = vsyncpa [#allocation10], 0 }
   0x3   :  { %15 = vsyncpa [#allocation5], 0  ;;  %s2416_s24 = smov [#allocation6]   ;;  %s2298_s28 = scalar_lea.hbm %s2583_s1, 4096 }
   0x4   :  { %s33_s25 = sshll.u32 %s2416_s24, 4  ;;  %p2299_p0 = scmp.ne.s32.totalorder %s2583_s1, %s2298_s28  ;;  %s34_s25 = int_to_ptr.vmem [resolvable:$true] %s33_s25 }
   0x5   :  { %p2302_p1 = scmp.lt.u32.totalorder %s2298_s28, %s2583_s1 }
   0x7   :  { %p2304_p2 = pnand %p2302_p1, %p2299_p0 }
   0x9   :  { %2307 = shalt.err (!%p2304_p2)
}
   0xa   :  { %s2308_s10 = scalar_lea.vmem %s34_s25, 4096  ;;  %p2313_p4 = scmp.lt.s32.totalorder %s34_s25, %s34_s25 }
   0xb   :  { %p2309_p3 = scmp.ne.s32.totalorder %s34_s25, %s2308_s10  ;;  %p2314_p5 = scmp.lt.s32.totalorder %s2308_s10, %s2308_s10 }
   0xd   :  { %p2315_p6 = por %p2314_p5, %p2313_p4 }
   0xf   :  { %p2316_p7 = pnand %p2315_p6, %p2309_p3 }
  0x11   :  { %2319 = shalt.err (!%p2316_p7)
}
  0x12   :  { %s2417_s11 = smov 256   ;;  %s2418_s12 = smov 16  }
  0x13   :  { %39 = dma.hbm_to_vmem [thread:$0]  %s2583_s1, 4096, %s34_s25, [#allocation7], %s2417_s11, %s2417_s11, %s2418_s12  }
  0x14   :  { %s2419_s15 = smov [#allocation3]   ;;  %s2320_s19 = scalar_lea.hbm %s2582_s0, 128 }
  0x15   :  { %s21_s16 = sshll.u32 %s2419_s15, 4  ;;  %p2321_p8 = scmp.ne.s32.totalorder %s2582_s0, %s2320_s19  ;;  %s22_s16 = int_to_ptr.vmem [resolvable:$true] %s21_s16 }
  0x16   :  { %p2324_p9 = scmp.lt.u32.totalorder %s2320_s19, %s2582_s0 }
  0x18   :  { %p2326_p10 = pnand %p2324_p9, %p2321_p8 }
  0x1a   :  { %2329 = shalt.err (!%p2326_p10)
}
  0x1b   :  { %s2330_s24 = scalar_lea.vmem %s22_s16, 128  ;;  %p2335_p12 = scmp.lt.s32.totalorder %s22_s16, %s22_s16 }
  0x1c   :  { %p2331_p11 = scmp.ne.s32.totalorder %s22_s16, %s2330_s24  ;;  %p2336_p13 = scmp.lt.s32.totalorder %s2330_s24, %s2330_s24 }
  0x1e   :  { %p2337_p0 = por %p2336_p13, %p2335_p12 }
  0x20   :  { %p2338_p1 = pnand %p2337_p0, %p2331_p11 }
  0x22   :  { %2341 = shalt.err (!%p2338_p1)
}
  0x23   :  { %s2420_s1 = smov 64   ;;  %s2421_s25 = smov 4  }
  0x24   :  { %27 = dma.hbm_to_vmem [thread:$0]  %s2582_s0, 128, %s22_s16, [#allocation4], %s2420_s1, %s2420_s1, %s2421_s25  }
  0x25   :  { %s2422_s28 = smov [#allocation8]   ;;  %s2423_s30 = smov [#allocation9]  }
  0x26   :  { %s47_s29 = sshll.u32 %s2422_s28, 4  ;;  %s61_s8 = sshll.u32 %s2423_s30, 4  ;;  %s48_s29 = int_to_ptr.vmem [resolvable:$true] %s47_s29  ;;  %s2498_s8 = int_to_ptr.vmem [resolvable:$true] %s61_s8 }
  0x27   :  { %s2342_s13 = scalar_lea.hbm %s2585_s3, 16384 }
  0x28   :  { %p2343_p2 = scmp.ne.s32.totalorder %s2585_s3, %s2342_s13  ;;  %p2346_p3 = scmp.lt.u32.totalorder %s2342_s13, %s2585_s3 }
  0x2a   :  { %p2348_p4 = pnand %p2346_p3, %p2343_p2 }
  0x2c   :  { %2351 = shalt.err (!%p2348_p4)
}
  0x2d   :  { %s2352_s0 = scalar_lea.vmem %s48_s29, 16384  ;;  %p2357_p6 = scmp.lt.s32.totalorder %s48_s29, %s48_s29 }
  0x2e   :  { %p2353_p5 = scmp.ne.s32.totalorder %s48_s29, %s2352_s0  ;;  %p2358_p7 = scmp.lt.s32.totalorder %s2352_s0, %s2352_s0 }
  0x30   :  { %p2359_p8 = por %p2358_p7, %p2357_p6 }
  0x32   :  { %p2360_p9 = pnand %p2359_p8, %p2353_p5 }
  0x34   :  { %2363 = shalt.err (!%p2360_p9)
}
  0x35   :  { %53 = dma.hbm_to_vmem [thread:$0]  %s2585_s3, 16384, %s48_s29, [#allocation7], %s2417_s11, %s2417_s11, %s2418_s12  }
  0x36   :  { %s2364_s22 = scalar_lea.hbm %s2587_s5, 4096 }
  0x37   :  { %p2365_p10 = scmp.ne.s32.totalorder %s2587_s5, %s2364_s22  ;;  %p2368_p11 = scmp.lt.u32.totalorder %s2364_s22, %s2587_s5 }
  0x39   :  { %p2370_p12 = pnand %p2368_p11, %p2365_p10 }
  0x3b   :  { %2373 = shalt.err (!%p2370_p12)
}
  0x3c   :  { %s2374_s28 = scalar_lea.vmem %s2498_s8, 4096  ;;  %p2379_p0 = scmp.lt.s32.totalorder %s2498_s8, %s2498_s8 }
  0x3d   :  { %p2375_p13 = scmp.ne.s32.totalorder %s2498_s8, %s2374_s28  ;;  %p2380_p1 = scmp.lt.s32.totalorder %s2374_s28, %s2374_s28 }
  0x3f   :  { %p2381_p2 = por %p2380_p1, %p2379_p0 }
  0x41   :  { %p2382_p3 = pnand %p2381_p2, %p2375_p13 }
  0x43   :  { %2385 = shalt.err (!%p2382_p3)
}
  0x44   :  { %67 = dma.hbm_to_vmem [thread:$0]  %s2587_s5, 4096, %s2498_s8, [#allocation10], %s2420_s1, %s2420_s1, %s2421_s25  }
  0x45   :  { %2408 = dma.done.wait [#allocation4], 128  }
  0x46   :  { %2409 = vsyncadd [#allocation4], 4294967168 }
  0x47   :  { %2410 = dma.done.wait [#allocation7], 20480  }
  0x48   :  { %2411 = vsyncadd [#allocation7], 4294946816 }
  0x49   :  { %2412 = dma.done.wait [#allocation10], 4096  }
  0x4a   :  { %2413 = vsyncadd [#allocation10], 4294963200  ;;  %v2424_v0 = vmov 0   ;;  %v2025_v1 = vld [vmem:[#allocation6 + $0x4] ss:$16 sps:$4 sm:$0xff]   ;;  %v2049_v29 = vld [vmem:[#allocation3] sm:$0xff]  }
  0x4b   :  { %337 = vmatprep.mubr.bf16.mxu0 %v2424_v0  ;;  %380 = vmatprep.mubr.bf16.mxu1 %v2424_v0  ;;  %v2027_v2 = vld [vmem:[#allocation6] ss:$16 sps:$4 sm:$0xff]   ;;  %v2028_v3 = vld [vmem:[#allocation6 + $0x24] ss:$16 sps:$4 sm:$0xff]   ;;  %v2050_v10 = vld [vmem:[#allocation6 + $0xc] ss:$16 sps:$4 sm:$0xff]  }
  0x4c   :  { %305 = vmatprep.subr.bf16.mxu0 %v2025_v1  ;;  %v2030_v4 = vld [vmem:[#allocation6 + $0x20] ss:$16 sps:$4 sm:$0xff]   ;;  %v2031_v5 = vld [vmem:[#allocation6 + $0x44] ss:$16 sps:$4 sm:$0xff]   ;;  %v2052_v11 = vld [vmem:[#allocation6 + $0x8] ss:$16 sps:$4 sm:$0xff]   ;;  %348 = vmatprep.subr.bf16.mxu1 %v2050_v10 }
  0x4d   :  { %306 = vmatpush1.bf16.msra.mxu0 %v2027_v2  ;;  %v2033_v6 = vld [vmem:[#allocation6 + $0x40] ss:$16 sps:$4 sm:$0xff]   ;;  %v2034_v7 = vld [vmem:[#allocation6 + $0x64] ss:$16 sps:$4 sm:$0xff]   ;;  %v2053_v12 = vld [vmem:[#allocation6 + $0x2c] ss:$16 sps:$4 sm:$0xff]   ;;  %349 = vmatpush1.bf16.msra.mxu1 %v2052_v11 }
  0x4e   :  { %307 = vmatprep.subr.bf16.mxu0 %v2028_v3  ;;  %v2036_v8 = vld [vmem:[#allocation6 + $0x60] ss:$16 sps:$4 sm:$0xff]   ;;  %v2037_v9 = vld [vmem:[#allocation6 + $0x84] ss:$16 sps:$4 sm:$0xff]   ;;  %v2055_v14 = vld [vmem:[#allocation6 + $0x28] ss:$16 sps:$4 sm:$0xff]   ;;  %350 = vmatprep.subr.bf16.mxu1 %v2053_v12 }
  0x4f   :  { %v2039_v13 = vld [vmem:[#allocation6 + $0x80] ss:$16 sps:$4 sm:$0xff]   ;;  %v2040_v15 = vld [vmem:[#allocation6 + $0xa4] ss:$16 sps:$4 sm:$0xff]   ;;  %v2056_v16 = vld [vmem:[#allocation6 + $0x4c] ss:$16 sps:$4 sm:$0xff]  }
  0x50   :  { %v2042_v17 = vld [vmem:[#allocation6 + $0xa0] ss:$16 sps:$4 sm:$0xff]   ;;  %v2058_v18 = vld [vmem:[#allocation6 + $0x48] ss:$16 sps:$4 sm:$0xff]   ;;  %v2043_v19 = vld [vmem:[#allocation6 + $0xc4] ss:$16 sps:$4 sm:$0xff]  }
  0x51   :  { %308 = vmatpush1.bf16.msra.mxu0 %v2030_v4  ;;  %351 = vmatpush1.bf16.msra.mxu1 %v2055_v14  ;;  %v2059_v20 = vld [vmem:[#allocation6 + $0x6c] ss:$16 sps:$4 sm:$0xff]   ;;  %v2045_v21 = vld [vmem:[#allocation6 + $0xc0] ss:$16 sps:$4 sm:$0xff]   ;;  %v2061_v22 = vld [vmem:[#allocation6 + $0x68] ss:$16 sps:$4 sm:$0xff]  }
  0x52   :  { %309 = vmatprep.subr.bf16.mxu0 %v2031_v5  ;;  %352 = vmatprep.subr.bf16.mxu1 %v2056_v16  ;;  %v2046_v23 = vld [vmem:[#allocation6 + $0xe4] ss:$16 sps:$4 sm:$0xff]   ;;  %v2062_v24 = vld [vmem:[#allocation6 + $0x8c] ss:$16 sps:$4 sm:$0xff]   ;;  %v2048_v25 = vld [vmem:[#allocation6 + $0xe0] ss:$16 sps:$4 sm:$0xff]  }
  0x53   :  { %v2064_v26 = vld [vmem:[#allocation6 + $0x88] ss:$16 sps:$4 sm:$0xff]   ;;  %v2065_v27 = vld [vmem:[#allocation6 + $0xac] ss:$16 sps:$4 sm:$0xff]   ;;  %v2076_v28 = vld [vmem:[#allocation8 + $0x4] ss:$16 sps:$4 sm:$0xff]  }
  0x54   :  { %v2067_v30 = vld [vmem:[#allocation6 + $0xa8] ss:$16 sps:$4 sm:$0xff]   ;;  %v2074_v31 = vld [vmem:[#allocation8] ss:$16 sps:$4 sm:$0xff]   ;;  %v2068_v32 = vld [vmem:[#allocation6 + $0xcc] ss:$16 sps:$4 sm:$0xff]  }
  0x55   :  { %310 = vmatpush1.bf16.msra.mxu0 %v2033_v6  ;;  %353 = vmatpush1.bf16.msra.mxu1 %v2058_v18  ;;  %v2082_v33 = vld [vmem:[#allocation8 + $0x24] ss:$16 sps:$4 sm:$0xff]   ;;  %v2070_v34 = vld [vmem:[#allocation6 + $0xc8] ss:$16 sps:$4 sm:$0xff]   ;;  %v2080_v35 = vld [vmem:[#allocation8 + $0x20] ss:$16 sps:$4 sm:$0xff]  }
  0x56   :  { %311 = vmatprep.subr.bf16.mxu0 %v2034_v7  ;;  %354 = vmatprep.subr.bf16.mxu1 %v2059_v20  ;;  %v2071_v36 = vld [vmem:[#allocation6 + $0xec] ss:$16 sps:$4 sm:$0xff]   ;;  %v2088_v37 = vld [vmem:[#allocation8 + $0x44] ss:$16 sps:$4 sm:$0xff]   ;;  %v2073_v38 = vld [vmem:[#allocation6 + $0xe8] ss:$16 sps:$4 sm:$0xff]  }
  0x57   :  { %v2086_v39 = vld [vmem:[#allocation8 + $0x40] ss:$16 sps:$4 sm:$0xff]   ;;  %v2079_v40 = vld [vmem:[#allocation8 + $0xc] ss:$16 sps:$4 sm:$0xff]   ;;  %v2094_v41 = vld [vmem:[#allocation8 + $0x64] ss:$16 sps:$4 sm:$0xff]  }
  0x58   :  { %v2077_v42 = vld [vmem:[#allocation8 + $0x8] ss:$16 sps:$4 sm:$0xff]   ;;  %v2092_v43 = vld [vmem:[#allocation8 + $0x60] ss:$16 sps:$4 sm:$0xff]   ;;  %v2085_v44 = vld [vmem:[#allocation8 + $0x2c] ss:$16 sps:$4 sm:$0xff]  }
  0x59   :  { %312 = vmatpush1.bf16.msra.mxu0 %v2036_v8  ;;  %355 = vmatpush1.bf16.msra.mxu1 %v2061_v22  ;;  %v2100_v45 = vld [vmem:[#allocation8 + $0x84] ss:$16 sps:$4 sm:$0xff]   ;;  %v2083_v46 = vld [vmem:[#allocation8 + $0x28] ss:$16 sps:$4 sm:$0xff]   ;;  %v2098_v47 = vld [vmem:[#allocation8 + $0x80] ss:$16 sps:$4 sm:$0xff]  }
  0x5a   :  { %313 = vmatprep.subr.bf16.mxu0 %v2037_v9  ;;  %356 = vmatprep.subr.bf16.mxu1 %v2062_v24  ;;  %v2091_v48 = vld [vmem:[#allocation8 + $0x4c] ss:$16 sps:$4 sm:$0xff]   ;;  %v2106_v49 = vld [vmem:[#allocation8 + $0xa4] ss:$16 sps:$4 sm:$0xff]   ;;  %v2089_v50 = vld [vmem:[#allocation8 + $0x48] ss:$16 sps:$4 sm:$0xff]  }
  0x5b   :  { %v2104_v51 = vld [vmem:[#allocation8 + $0xa0] ss:$16 sps:$4 sm:$0xff]   ;;  %v2097_v52 = vld [vmem:[#allocation8 + $0x6c] ss:$16 sps:$4 sm:$0xff]   ;;  %v2112_v53 = vld [vmem:[#allocation8 + $0xc4] ss:$16 sps:$4 sm:$0xff]  }
  0x5c   :  { %v2095_v54 = vld [vmem:[#allocation8 + $0x68] ss:$16 sps:$4 sm:$0xff]   ;;  %v2110_v55 = vld [vmem:[#allocation8 + $0xc0] ss:$16 sps:$4 sm:$0xff]   ;;  %v2103_v56 = vld [vmem:[#allocation8 + $0x8c] ss:$16 sps:$4 sm:$0xff]  }
  0x5d   :  { %314 = vmatpush1.bf16.msra.mxu0 %v2039_v13  ;;  %357 = vmatpush1.bf16.msra.mxu1 %v2064_v26  ;;  %v2118_v57 = vld [vmem:[#allocation8 + $0xe4] ss:$16 sps:$4 sm:$0xff]   ;;  %v2101_v58 = vld [vmem:[#allocation8 + $0x88] ss:$16 sps:$4 sm:$0xff]   ;;  %v2109_v59 = vld [vmem:[#allocation8 + $0xac] ss:$16 sps:$4 sm:$0xff]  }
  0x5e   :  { %315 = vmatprep.subr.bf16.mxu0 %v2040_v15  ;;  %358 = vmatprep.subr.bf16.mxu1 %v2065_v27  ;;  %v2116_v60 = vld [vmem:[#allocation8 + $0xe0] ss:$16 sps:$4 sm:$0xff]   ;;  %v2124_v61 = vld [vmem:[#allocation8 + $0x104] ss:$16 sps:$4 sm:$0xff]   ;;  %v2107_v62 = vld [vmem:[#allocation8 + $0xa8] ss:$16 sps:$4 sm:$0xff]  }
  0x5f   :  { %v2122_v63 = vld [vmem:[#allocation8 + $0x100] ss:$16 sps:$4 sm:$0xff]   ;;  %v2115_v0 = vld [vmem:[#allocation8 + $0xcc] ss:$16 sps:$4 sm:$0xff]   ;;  %v2130_v1 = vld [vmem:[#allocation8 + $0x124] ss:$16 sps:$4 sm:$0xff]  }
  0x60   :  { %v2113_v2 = vld [vmem:[#allocation8 + $0xc8] ss:$16 sps:$4 sm:$0xff]   ;;  %v2128_v3 = vld [vmem:[#allocation8 + $0x120] ss:$16 sps:$4 sm:$0xff]   ;;  %v2121_v4 = vld [vmem:[#allocation8 + $0xec] ss:$16 sps:$4 sm:$0xff]  }
  0x61   :  { %316 = vmatpush1.bf16.msra.mxu0 %v2042_v17  ;;  %359 = vmatpush1.bf16.msra.mxu1 %v2067_v30  ;;  %v2136_v5 = vld [vmem:[#allocation8 + $0x144] ss:$16 sps:$4 sm:$0xff]   ;;  %v2119_v6 = vld [vmem:[#allocation8 + $0xe8] ss:$16 sps:$4 sm:$0xff]   ;;  %v2134_v7 = vld [vmem:[#allocation8 + $0x140] ss:$16 sps:$4 sm:$0xff]  }
  0x62   :  { %317 = vmatprep.subr.bf16.mxu0 %v2043_v19  ;;  %360 = vmatprep.subr.bf16.mxu1 %v2068_v32  ;;  %v2127_v8 = vld [vmem:[#allocation8 + $0x10c] ss:$16 sps:$4 sm:$0xff]   ;;  %v2142_v9 = vld [vmem:[#allocation8 + $0x164] ss:$16 sps:$4 sm:$0xff]   ;;  %v2125_v10 = vld [vmem:[#allocation8 + $0x108] ss:$16 sps:$4 sm:$0xff]  }
  0x63   :  { %v2140_v11 = vld [vmem:[#allocation8 + $0x160] ss:$16 sps:$4 sm:$0xff]   ;;  %v2133_v12 = vld [vmem:[#allocation8 + $0x12c] ss:$16 sps:$4 sm:$0xff]   ;;  %v2148_v13 = vld [vmem:[#allocation8 + $0x184] ss:$16 sps:$4 sm:$0xff]  }
  0x64   :  { %v2131_v14 = vld [vmem:[#allocation8 + $0x128] ss:$16 sps:$4 sm:$0xff]   ;;  %v2146_v15 = vld [vmem:[#allocation8 + $0x180] ss:$16 sps:$4 sm:$0xff]   ;;  %v2139_v16 = vld [vmem:[#allocation8 + $0x14c] ss:$16 sps:$4 sm:$0xff]  }
  0x65   :  { %318 = vmatpush1.bf16.msra.mxu0 %v2045_v21  ;;  %361 = vmatpush1.bf16.msra.mxu1 %v2070_v34  ;;  %v2154_v17 = vld [vmem:[#allocation8 + $0x1a4] ss:$16 sps:$4 sm:$0xff]   ;;  %v2137_v18 = vld [vmem:[#allocation8 + $0x148] ss:$16 sps:$4 sm:$0xff]   ;;  %v2152_v19 = vld [vmem:[#allocation8 + $0x1a0] ss:$16 sps:$4 sm:$0xff]  }
  0x66   :  { %319 = vmatprep.subr.bf16.mxu0 %v2046_v23  ;;  %362 = vmatprep.subr.bf16.mxu1 %v2071_v36  ;;  %v2145_v20 = vld [vmem:[#allocation8 + $0x16c] ss:$16 sps:$4 sm:$0xff]   ;;  %v2143_v21 = vld [vmem:[#allocation8 + $0x168] ss:$16 sps:$4 sm:$0xff]   ;;  %v2160_v26 = vld [vmem:[#allocation8 + $0x1c4] ss:$16 sps:$4 sm:$0xff]   ;;  %v119_v36 = vlaneseq }
  0x67   :  { %v2151_v22 = vld [vmem:[#allocation8 + $0x18c] ss:$16 sps:$4 sm:$0xff]   ;;  %v2149_v23 = vld [vmem:[#allocation8 + $0x188] ss:$16 sps:$4 sm:$0xff]   ;;  %v2166_v30 = vld [vmem:[#allocation8 + $0x1e4] ss:$16 sps:$4 sm:$0xff]  }
  0x68   :  { %v2157_v24 = vld [vmem:[#allocation8 + $0x1ac] ss:$16 sps:$4 sm:$0xff]   ;;  %v2164_v32 = vld [vmem:[#allocation8 + $0x1e0] ss:$16 sps:$4 sm:$0xff]   ;;  %v2172_v34 = vld [vmem:[#allocation8 + $0x204] ss:$16 sps:$4 sm:$0xff]  }
  0x69   :  { %320 = vmatpush1.bf16.msra.mxu0 %v2048_v25  ;;  %363 = vmatpush1.bf16.msra.mxu1 %v2073_v38  ;;  %v2155_v25 = vld [vmem:[#allocation8 + $0x1a8] ss:$16 sps:$4 sm:$0xff]   ;;  %v2163_v27 = vld [vmem:[#allocation8 + $0x1cc] ss:$16 sps:$4 sm:$0xff]   ;;  %s2425_s29 = smov [#allocation11]  }
  0x6a   :  { %1201 = vmatprep.subr.bf16.mxu0 %v2076_v28  ;;  %1287 = vmatprep.subr.bf16.mxu1 %v2079_v40  ;;  %v2158_v28 = vld [vmem:[#allocation8 + $0x1c0] ss:$16 sps:$4 sm:$0xff]   ;;  %s1745_s30 = sshll.u32 %s2425_s29, 4  ;;  %s1746_s30 = int_to_ptr.vmem [resolvable:$true] %s1745_s30 }
  0x6b   :  { %p2391_p5 = scmp.lt.s32.totalorder %s1746_s30, %s1746_s30 }
  0x6c   :  { %338 = vmatmul.mubr.bf16.vlgmr.msra.gmra.mrb[0].mxu0 %v2049_v29  ;;  %381 = vmatmul.mubr.bf16.vlgmr.msra.gmra.mrb[0].mxu1 %v2049_v29  ;;  %v2161_v29 = vld [vmem:[#allocation8 + $0x1c8] ss:$16 sps:$4 sm:$0xff]  }
  0x6d   :  { %1202 = vmatpush1.bf16.msra.mxu0 %v2074_v31  ;;  %1288 = vmatpush1.bf16.msra.mxu1 %v2077_v42  ;;  %v2169_v31 = vld [vmem:[#allocation8 + $0x1ec] ss:$16 sps:$4 sm:$0xff]  }
  0x6e   :  { %1203 = vmatprep.subr.bf16.mxu0 %v2082_v33  ;;  %1289 = vmatprep.subr.bf16.mxu1 %v2085_v44  ;;  %v2167_v33 = vld [vmem:[#allocation8 + $0x1e8] ss:$16 sps:$4 sm:$0xff]  }
  0x71   :  { %1204 = vmatpush1.bf16.msra.mxu0 %v2080_v35  ;;  %1290 = vmatpush1.bf16.msra.mxu1 %v2083_v46  ;;  %v2175_v35 = vld [vmem:[#allocation8 + $0x20c] ss:$16 sps:$4 sm:$0xff]  }
  0x72   :  { %1205 = vmatprep.subr.bf16.mxu0 %v2088_v37  ;;  %1291 = vmatprep.subr.bf16.mxu1 %v2091_v48  ;;  %v2535_v37 = vshrl.u32 %v119_v36, 7  ;;  %v2209_v36 = vld [vmem:[#allocation8 + $0x2c8] ss:$16 sps:$4 sm:$0xff]  }
  0x74   :  { %v121_v38 = vsub.s32 0, %v2535_v37  ;;  %v125_v40 = vsub.s32 1, %v2535_v37 }
  0x75   :  { %1206 = vmatpush1.bf16.msra.mxu0 %v2086_v39  ;;  %1292 = vmatpush1.bf16.msra.mxu1 %v2089_v50  ;;  %v117_v39 = vld [vmem:[%s2584_s2] sm:$0xf] }
  0x76   :  { %1207 = vmatprep.subr.bf16.mxu0 %v2094_v41  ;;  %1293 = vmatprep.subr.bf16.mxu1 %v2097_v52  ;;  %v122_v41 = vrot.slane %v117_v39, %v121_v38  ;;  %v126_v42 = vrot.slane %v117_v39, %v125_v40 }
  0x79   :  { %1208 = vmatpush1.bf16.msra.mxu0 %v2092_v43  ;;  %1294 = vmatpush1.bf16.msra.mxu1 %v2095_v54 }
  0x7a   :  { %1209 = vmatprep.subr.bf16.mxu0 %v2100_v45  ;;  %1295 = vmatprep.subr.bf16.mxu1 %v2103_v56  ;;  %v133_v56 = vsub.s32 3, %v2535_v37 }
  0x7d   :  { %1210 = vmatpush1.bf16.msra.mxu0 %v2098_v47  ;;  %1296 = vmatpush1.bf16.msra.mxu1 %v2101_v58 }
  0x7e   :  { %1211 = vmatprep.subr.bf16.mxu0 %v2106_v49  ;;  %1297 = vmatprep.subr.bf16.mxu1 %v2109_v59  ;;  %v2170_v59 = vld [vmem:[#allocation8 + $0x200] ss:$16 sps:$4 sm:$0xff]  }
  0x81   :  { %1212 = vmatpush1.bf16.msra.mxu0 %v2104_v51  ;;  %1298 = vmatpush1.bf16.msra.mxu1 %v2107_v62  ;;  %v2181_v62 = vld [vmem:[#allocation8 + $0x22c] ss:$16 sps:$4 sm:$0xff]  }
  0x82   :  { %1213 = vmatprep.subr.bf16.mxu0 %v2112_v53  ;;  %1299 = vmatprep.subr.bf16.mxu1 %v2115_v0  ;;  %v129_v53 = vsub.s32 2, %v2535_v37  ;;  %v134_v0 = vrot.slane %v117_v39, %v133_v56 }
  0x85   :  { %1214 = vmatpush1.bf16.msra.mxu0 %v2110_v55  ;;  %1300 = vmatpush1.bf16.msra.mxu1 %v2113_v2  ;;  %v2179_v2 = vld [vmem:[#allocation8 + $0x228] ss:$16 sps:$4 sm:$0xff]  }
  0x86   :  { %1215 = vmatprep.subr.bf16.mxu0 %v2118_v57  ;;  %1301 = vmatprep.subr.bf16.mxu1 %v2121_v4  ;;  %v2184_v4 = vld [vmem:[#allocation8 + $0x244] ss:$16 sps:$4 sm:$0xff]  }
  0x89   :  { %1216 = vmatpush1.bf16.msra.mxu0 %v2116_v60  ;;  %1302 = vmatpush1.bf16.msra.mxu1 %v2119_v6  ;;  %v2173_v60 = vld [vmem:[#allocation8 + $0x208] ss:$16 sps:$4 sm:$0xff]  }
  0x8a   :  { %1217 = vmatprep.subr.bf16.mxu0 %v2124_v61  ;;  %1303 = vmatprep.subr.bf16.mxu1 %v2127_v8  ;;  %v2178_v61 = vld [vmem:[#allocation8 + $0x224] ss:$16 sps:$4 sm:$0xff]  }
  0x8d   :  { %1218 = vmatpush1.bf16.msra.mxu0 %v2122_v63  ;;  %1304 = vmatpush1.bf16.msra.mxu1 %v2125_v10  ;;  %v130_v63 = vrot.slane %v117_v39, %v129_v53  ;;  %v2214_v39 = vld [vmem:[#allocation8 + $0x2e4] ss:$16 sps:$4 sm:$0xff]  }
  0x8e   :  { %1219 = vmatprep.subr.bf16.mxu0 %v2130_v1  ;;  %1305 = vmatprep.subr.bf16.mxu1 %v2133_v12  ;;  %v2176_v1 = vld [vmem:[#allocation8 + $0x220] ss:$16 sps:$4 sm:$0xff]  }
  0x91   :  { %1220 = vmatpush1.bf16.msra.mxu0 %v2128_v3  ;;  %1306 = vmatpush1.bf16.msra.mxu1 %v2131_v14  ;;  %v2185_v14 = vld [vmem:[#allocation8 + $0x248] ss:$16 sps:$4 sm:$0xff]  }
  0x92   :  { %1221 = vmatprep.subr.bf16.mxu0 %v2136_v5  ;;  %1307 = vmatprep.subr.bf16.mxu1 %v2139_v16  ;;  %v2187_v5 = vld [vmem:[#allocation8 + $0x24c] ss:$16 sps:$4 sm:$0xff]  }
  0x95   :  { %1222 = vmatpush1.bf16.msra.mxu0 %v2134_v7  ;;  %1308 = vmatpush1.bf16.msra.mxu1 %v2137_v18  ;;  %v2193_v18 = vld [vmem:[#allocation8 + $0x26c] ss:$16 sps:$4 sm:$0xff]  }
  0x96   :  { %1223 = vmatprep.subr.bf16.mxu0 %v2142_v9  ;;  %1309 = vmatprep.subr.bf16.mxu1 %v2145_v20 }
  0x99   :  { %1224 = vmatpush1.bf16.msra.mxu0 %v2140_v11  ;;  %1310 = vmatpush1.bf16.msra.mxu1 %v2143_v21 }
  0x9a   :  { %1225 = vmatprep.subr.bf16.mxu0 %v2148_v13  ;;  %1311 = vmatprep.subr.bf16.mxu1 %v2151_v22  ;;  %v2182_v13 = vld [vmem:[#allocation8 + $0x240] ss:$16 sps:$4 sm:$0xff]  }
  0x9b   :  { %v2188_v22 = vld [vmem:[#allocation8 + $0x260] ss:$16 sps:$4 sm:$0xff]  }
  0x9d   :  { %1226 = vmatpush1.bf16.msra.mxu0 %v2146_v15  ;;  %1312 = vmatpush1.bf16.msra.mxu1 %v2149_v23  ;;  %v2191_v23 = vld [vmem:[#allocation8 + $0x268] ss:$16 sps:$4 sm:$0xff]  }
  0x9e   :  { %1227 = vmatprep.subr.bf16.mxu0 %v2154_v17  ;;  %1313 = vmatprep.subr.bf16.mxu1 %v2157_v24  ;;  %v2190_v17 = vld [vmem:[#allocation8 + $0x264] ss:$16 sps:$4 sm:$0xff]  }
  0xa1   :  { %1228 = vmatpush1.bf16.msra.mxu0 %v2152_v19  ;;  %1314 = vmatpush1.bf16.msra.mxu1 %v2155_v25  ;;  %v2196_v25 = vld [vmem:[#allocation8 + $0x284] ss:$16 sps:$4 sm:$0xff]  }
  0xa2   :  { %1229 = vmatprep.subr.bf16.mxu0 %v2160_v26  ;;  %1315 = vmatprep.subr.bf16.mxu1 %v2163_v27  ;;  %v2199_v26 = vld [vmem:[#allocation8 + $0x28c] ss:$16 sps:$4 sm:$0xff]   ;;  %v2194_v27 = vld [vmem:[#allocation8 + $0x280] ss:$16 sps:$4 sm:$0xff]  }
  0xa5   :  { %1230 = vmatpush1.bf16.msra.mxu0 %v2158_v28  ;;  %1316 = vmatpush1.bf16.msra.mxu1 %v2161_v29  ;;  %v2197_v28 = vld [vmem:[#allocation8 + $0x288] ss:$16 sps:$4 sm:$0xff]   ;;  %v2202_v29 = vld [vmem:[#allocation8 + $0x2a4] ss:$16 sps:$4 sm:$0xff]  }
  0xa6   :  { %1231 = vmatprep.subr.bf16.mxu0 %v2166_v30  ;;  %1317 = vmatprep.subr.bf16.mxu1 %v2169_v31  ;;  %v2205_v30 = vld [vmem:[#allocation8 + $0x2ac] ss:$16 sps:$4 sm:$0xff]   ;;  %v2200_v31 = vld [vmem:[#allocation8 + $0x2a0] ss:$16 sps:$4 sm:$0xff]  }
  0xa9   :  { %1232 = vmatpush1.bf16.msra.mxu0 %v2164_v32  ;;  %1318 = vmatpush1.bf16.msra.mxu1 %v2167_v33  ;;  %v2203_v32 = vld [vmem:[#allocation8 + $0x2a8] ss:$16 sps:$4 sm:$0xff]   ;;  %v2208_v33 = vld [vmem:[#allocation8 + $0x2c4] ss:$16 sps:$4 sm:$0xff]  }
  0xaa   :  { %1244 = vmatprep.subr.bf16.mxu0 %v2172_v34  ;;  %1330 = vmatprep.subr.bf16.mxu1 %v2175_v35  ;;  %v2211_v34 = vld [vmem:[#allocation8 + $0x2cc] ss:$16 sps:$4 sm:$0xff]   ;;  %v2206_v35 = vld [vmem:[#allocation8 + $0x2c0] ss:$16 sps:$4 sm:$0xff]  }
 0x13f   :  { %v339_v43 = vpop.f32.mrb[0].mxu0  ;;  %v382_v3 = vpop.f32.mrb[0].mxu1 }
 0x140   :  { %v340_v44 = vadd.f32 %v339_v43, %v122_v41  ;;  %v341_v45 = vpop.f32.mrb[1].mxu0  ;;  %v383_v6 = vadd.f32 %v382_v3, %v130_v63  ;;  %v384_v7 = vpop.f32.mrb[1].mxu1  ;;  %v2215_v43 = vld [vmem:[#allocation8 + $0x2e8] ss:$16 sps:$4 sm:$0xff]   ;;  %v2253_v3 = vld [vmem:[#allocation8 + $0x3ac] ss:$16 sps:$4 sm:$0xff]  }
 0x141   :  { %v342_v46 = vadd.f32 %v341_v45, %v126_v42  ;;  %v343_v47 = vpop.f32.mrb[2].mxu0  ;;  %v385_v8 = vadd.f32 %v384_v7, %v134_v0  ;;  %v386_v9 = vpop.f32.mrb[2].mxu1  ;;  %v2223_v45 = vld [vmem:[#allocation8 + $0x30c] ss:$16 sps:$4 sm:$0xff]  }
 0x142   :  { %v344_v48 = vadd.f32 %v343_v47, %v122_v41  ;;  %v345_v49 = vpop.f32.mrb[3].mxu0  ;;  %v391_v51 = vmax.f32 %v340_v44, 0.0  ;;  %v393_v10 = vmax.f32 %v383_v6, 0.0  ;;  %v387_v11 = vadd.f32 %v386_v9, %v130_v63  ;;  %v388_v12 = vpop.f32.mrb[3].mxu1  ;;  %v2217_v41 = vld [vmem:[#allocation8 + $0x2ec] ss:$16 sps:$4 sm:$0xff]  }
 0x143   :  { %v346_v50 = vadd.f32 %v345_v49, %v126_v42  ;;  %v392_v54 = vmax.f32 %v342_v46, 0.0  ;;  %v394_v15 = vmax.f32 %v385_v8, 0.0  ;;  %v389_v16 = vadd.f32 %v388_v12, %v134_v0  ;;  %v2212_v42 = vld [vmem:[#allocation8 + $0x2e0] ss:$16 sps:$4 sm:$0xff]   ;;  %v2220_v44 = vld [vmem:[#allocation8 + $0x304] ss:$16 sps:$4 sm:$0xff]  }
 0x144   :  { %v395_v52 = vmax.f32 %v344_v48, 0.0  ;;  %v397_v19 = vmax.f32 %v387_v11, 0.0  ;;  %v2218_v46 = vld [vmem:[#allocation8 + $0x300] ss:$16 sps:$4 sm:$0xff]   ;;  %v2221_v47 = vld [vmem:[#allocation8 + $0x308] ss:$16 sps:$4 sm:$0xff]  }
 0x145   :  { %v396_v55 = vmax.f32 %v346_v50, 0.0  ;;  %v398_v20 = vmax.f32 %v389_v16, 0.0  ;;  %v2226_v48 = vld [vmem:[#allocation8 + $0x324] ss:$16 sps:$4 sm:$0xff]   ;;  %v2229_v49 = vld [vmem:[#allocation8 + $0x32c] ss:$16 sps:$4 sm:$0xff]  }
 0x146   :  { %v399_v57 = vpack.c.bf16 %v395_v52, %v391_v51  ;;  %v2552_v21 = vpack.c.bf16 %v397_v19, %v393_v10  ;;  %v2224_v50 = vld [vmem:[#allocation8 + $0x320] ss:$16 sps:$4 sm:$0xff]   ;;  %v2227_v51 = vld [vmem:[#allocation8 + $0x328] ss:$16 sps:$4 sm:$0xff]   ;;  %v2232_v52 = vld [vmem:[#allocation8 + $0x344] ss:$16 sps:$4 sm:$0xff]  }
 0x147   :  { %v400_v58 = vpack.c.bf16 %v396_v55, %v392_v54  ;;  %v402_v24 = vpack.c.bf16 %v398_v20, %v394_v15  ;;  %v2235_v54 = vld [vmem:[#allocation8 + $0x34c] ss:$16 sps:$4 sm:$0xff]   ;;  %v2230_v55 = vld [vmem:[#allocation8 + $0x340] ss:$16 sps:$4 sm:$0xff]   ;;  %v2256_v6 = vld [vmem:[#allocation8 + $0x3c4] ss:$16 sps:$4 sm:$0xff]  }
 0x148   :  { %v2247_v63 = vld [vmem:[#allocation8 + $0x38c] ss:$16 sps:$4 sm:$0xff]   ;;  %v2242_v0 = vld [vmem:[#allocation8 + $0x380] ss:$16 sps:$4 sm:$0xff]   ;;  %v2257_v9 = vld [vmem:[#allocation8 + $0x3c8] ss:$16 sps:$4 sm:$0xff]  }
 0x149   :  { %1233 = vmatprep.mubr.bf16.mxu0 %v400_v58  ;;  %1319 = vmatprep.mubr.bf16.mxu1 %v400_v58  ;;  %v2238_v58 = vld [vmem:[#allocation8 + $0x364] ss:$16 sps:$4 sm:$0xff]   ;;  %v2259_v7 = vld [vmem:[#allocation8 + $0x3cc] ss:$16 sps:$4 sm:$0xff]   ;;  %v2254_v8 = vld [vmem:[#allocation8 + $0x3c0] ss:$16 sps:$4 sm:$0xff]  }
 0x14a   :  { %1234 = vmatmul.mubr.bf16.vlgmr.msra.gmra.mrb[4].mxu0 %v399_v57  ;;  %1320 = vmatmul.mubr.bf16.vlgmr.msra.gmra.mrb[4].mxu1 %v399_v57  ;;  %v2233_v57 = vld [vmem:[#allocation8 + $0x348] ss:$16 sps:$4 sm:$0xff]   ;;  %v2262_v10 = vld [vmem:[#allocation8 + $0x3e4] ss:$16 sps:$4 sm:$0xff]   ;;  %v2265_v11 = vld [vmem:[#allocation8 + $0x3ec] ss:$16 sps:$4 sm:$0xff]  }
 0x14b   :  { %1245 = vmatpush1.bf16.msra.mxu0 %v2170_v59  ;;  %1331 = vmatpush1.bf16.msra.mxu1 %v2173_v60  ;;  %v2241_v59 = vld [vmem:[#allocation8 + $0x36c] ss:$16 sps:$4 sm:$0xff]   ;;  %v2236_v60 = vld [vmem:[#allocation8 + $0x360] ss:$16 sps:$4 sm:$0xff]  }
 0x14c   :  { %1246 = vmatprep.subr.bf16.mxu0 %v2178_v61  ;;  %1332 = vmatprep.subr.bf16.mxu1 %v2181_v62  ;;  %v2239_v61 = vld [vmem:[#allocation8 + $0x368] ss:$16 sps:$4 sm:$0xff]   ;;  %v2244_v62 = vld [vmem:[#allocation8 + $0x384] ss:$16 sps:$4 sm:$0xff]   ;;  %v2260_v12 = vld [vmem:[#allocation8 + $0x3e0] ss:$16 sps:$4 sm:$0xff]  }
 0x14d   :  { %1276 = vmatprep.mubr.bf16.mxu0 %v402_v24  ;;  %1362 = vmatprep.mubr.bf16.mxu1 %v402_v24  ;;  %v2267_v15 = vld [vmem:[#allocation9 + $0xc0] sm:$0xff]   ;;  %v2271_v19 = vld [vmem:[#allocation9 + $0xc8] sm:$0xff]   ;;  %v2275_v24 = vld [vmem:[#allocation9 + $0xd0] sm:$0xff]  }
 0x14e   :  { %v2268_v16 = vld [vmem:[#allocation9] sm:$0xff]   ;;  %v2272_v20 = vld [vmem:[#allocation9 + $0x8] sm:$0xff]  }
 0x14f   :  { %1247 = vmatpush1.bf16.msra.mxu0 %v2176_v1  ;;  %1333 = vmatpush1.bf16.msra.mxu1 %v2179_v2  ;;  %v2245_v1 = vld [vmem:[#allocation8 + $0x388] ss:$16 sps:$4 sm:$0xff]   ;;  %v2250_v2 = vld [vmem:[#allocation8 + $0x3a4] ss:$16 sps:$4 sm:$0xff]  }
 0x150   :  { %1248 = vmatprep.subr.bf16.mxu0 %v2184_v4  ;;  %1334 = vmatprep.subr.bf16.mxu1 %v2187_v5  ;;  %v2248_v4 = vld [vmem:[#allocation8 + $0x3a0] ss:$16 sps:$4 sm:$0xff]   ;;  %v2251_v5 = vld [vmem:[#allocation8 + $0x3a8] ss:$16 sps:$4 sm:$0xff]  }
 0x153   :  { %1249 = vmatpush1.bf16.msra.mxu0 %v2182_v13  ;;  %1335 = vmatpush1.bf16.msra.mxu1 %v2185_v14  ;;  %v2263_v13 = vld [vmem:[#allocation8 + $0x3e8] ss:$16 sps:$4 sm:$0xff]   ;;  %v2266_v14 = vld [vmem:[#allocation9 + $0x40] sm:$0xff]  }
 0x154   :  { %1250 = vmatprep.subr.bf16.mxu0 %v2190_v17  ;;  %1336 = vmatprep.subr.bf16.mxu1 %v2193_v18  ;;  %v2269_v17 = vld [vmem:[#allocation9 + $0x80] sm:$0xff]   ;;  %v2270_v18 = vld [vmem:[#allocation9 + $0x48] sm:$0xff]  }
 0x157   :  { %1251 = vmatpush1.bf16.msra.mxu0 %v2188_v22  ;;  %1337 = vmatpush1.bf16.msra.mxu1 %v2191_v23  ;;  %v2273_v22 = vld [vmem:[#allocation9 + $0x88] sm:$0xff]   ;;  %v2274_v23 = vld [vmem:[#allocation9 + $0x50] sm:$0xff]  }
 0x158   :  { %1252 = vmatprep.subr.bf16.mxu0 %v2196_v25  ;;  %1338 = vmatprep.subr.bf16.mxu1 %v2199_v26  ;;  %v2276_v25 = vld [vmem:[#allocation9 + $0x10] sm:$0xff]  }
 0x159   :  { %v2277_v26 = vld [vmem:[#allocation9 + $0x90] sm:$0xff]  }
 0x15b   :  { %1253 = vmatpush1.bf16.msra.mxu0 %v2194_v27  ;;  %1339 = vmatpush1.bf16.msra.mxu1 %v2197_v28  ;;  %v2278_v27 = vld [vmem:[#allocation9 + $0x58] sm:$0xff]  }
 0x15c   :  { %1254 = vmatprep.subr.bf16.mxu0 %v2202_v29  ;;  %1340 = vmatprep.subr.bf16.mxu1 %v2205_v30  ;;  %v2279_v28 = vld [vmem:[#allocation9 + $0xd8] sm:$0xff]   ;;  %v2282_v30 = vld [vmem:[#allocation9 + $0x60] sm:$0xff]  }
 0x15d   :  { %v2280_v29 = vld [vmem:[#allocation9 + $0x18] sm:$0xff]  }
 0x15f   :  { %1255 = vmatpush1.bf16.msra.mxu0 %v2200_v31  ;;  %1341 = vmatpush1.bf16.msra.mxu1 %v2203_v32  ;;  %v2283_v31 = vld [vmem:[#allocation9 + $0xe0] sm:$0xff]  }
 0x160   :  { %1256 = vmatprep.subr.bf16.mxu0 %v2208_v33  ;;  %1342 = vmatprep.subr.bf16.mxu1 %v2211_v34  ;;  %v2284_v32 = vld [vmem:[#allocation9 + $0x20] sm:$0xff]   ;;  %v2286_v34 = vld [vmem:[#allocation9 + $0x68] sm:$0xff]  }
 0x161   :  { %v2285_v33 = vld [vmem:[#allocation9 + $0xa0] sm:$0xff]  }
 0x163   :  { %1257 = vmatpush1.bf16.msra.mxu0 %v2206_v35  ;;  %1343 = vmatpush1.bf16.msra.mxu1 %v2209_v36  ;;  %v2287_v35 = vld [vmem:[#allocation9 + $0xe8] sm:$0xff]  }
 0x164   :  { %1258 = vmatprep.subr.bf16.mxu0 %v2214_v39  ;;  %1344 = vmatprep.subr.bf16.mxu1 %v2217_v41  ;;  %v2288_v36 = vld [vmem:[#allocation9 + $0x28] sm:$0xff]   ;;  %v2290_v41 = vld [vmem:[#allocation9 + $0x70] sm:$0xff]  }
 0x165   :  { %v2289_v39 = vld [vmem:[#allocation9 + $0xa8] sm:$0xff]  }
 0x167   :  { %1259 = vmatpush1.bf16.msra.mxu0 %v2212_v42  ;;  %1345 = vmatpush1.bf16.msra.mxu1 %v2215_v43  ;;  %v2291_v42 = vld [vmem:[#allocation9 + $0xf0] sm:$0xff]  }
 0x168   :  { %1260 = vmatprep.subr.bf16.mxu0 %v2220_v44  ;;  %1346 = vmatprep.subr.bf16.mxu1 %v2223_v45  ;;  %v2292_v43 = vld [vmem:[#allocation9 + $0x30] sm:$0xff]   ;;  %v2294_v45 = vld [vmem:[#allocation9 + $0x78] sm:$0xff]  }
 0x169   :  { %v2293_v44 = vld [vmem:[#allocation9 + $0xb0] sm:$0xff]  }
 0x16b   :  { %1261 = vmatpush1.bf16.msra.mxu0 %v2218_v46  ;;  %1347 = vmatpush1.bf16.msra.mxu1 %v2221_v47  ;;  %v2295_v46 = vld [vmem:[#allocation9 + $0xf8] sm:$0xff]  }
 0x16c   :  { %1262 = vmatprep.subr.bf16.mxu0 %v2226_v48  ;;  %1348 = vmatprep.subr.bf16.mxu1 %v2229_v49  ;;  %v2296_v47 = vld [vmem:[#allocation9 + $0x38] sm:$0xff]  }
 0x16d   :  { %v2297_v48 = vld [vmem:[#allocation9 + $0xb8] sm:$0xff]  }
 0x16e   :  { %v539_v49 = vld [vmem:[%s2586_s4] sm:$0xf] }
 0x16f   :  { %1263 = vmatpush1.bf16.msra.mxu0 %v2224_v50  ;;  %1349 = vmatpush1.bf16.msra.mxu1 %v2227_v51  ;;  %v544_v50 = vrot.slane %v539_v49, %v121_v38  ;;  %v552_v51 = vrot.slane %v539_v49, %v129_v53 }
 0x170   :  { %1264 = vmatprep.subr.bf16.mxu0 %v2232_v52  ;;  %1350 = vmatprep.subr.bf16.mxu1 %v2235_v54  ;;  %v548_v52 = vrot.slane %v539_v49, %v125_v40  ;;  %v556_v54 = vrot.slane %v539_v49, %v133_v56 }
 0x173   :  { %1265 = vmatpush1.bf16.msra.mxu0 %v2230_v55  ;;  %1351 = vmatpush1.bf16.msra.mxu1 %v2233_v57 }
 0x174   :  { %1266 = vmatprep.subr.bf16.mxu0 %v2238_v58  ;;  %1352 = vmatprep.subr.bf16.mxu1 %v2241_v59 }
 0x177   :  { %1267 = vmatpush1.bf16.msra.mxu0 %v2236_v60  ;;  %1353 = vmatpush1.bf16.msra.mxu1 %v2239_v61 }
 0x178   :  { %1268 = vmatprep.subr.bf16.mxu0 %v2244_v62  ;;  %1354 = vmatprep.subr.bf16.mxu1 %v2247_v63 }
 0x17b   :  { %1269 = vmatpush1.bf16.msra.mxu0 %v2242_v0  ;;  %1355 = vmatpush1.bf16.msra.mxu1 %v2245_v1 }
 0x17c   :  { %1270 = vmatprep.subr.bf16.mxu0 %v2250_v2  ;;  %1356 = vmatprep.subr.bf16.mxu1 %v2253_v3 }
 0x17f   :  { %1271 = vmatpush1.bf16.msra.mxu0 %v2248_v4  ;;  %1357 = vmatpush1.bf16.msra.mxu1 %v2251_v5 }
 0x180   :  { %1272 = vmatprep.subr.bf16.mxu0 %v2256_v6  ;;  %1358 = vmatprep.subr.bf16.mxu1 %v2259_v7 }
 0x183   :  { %1273 = vmatpush1.bf16.msra.mxu0 %v2254_v8  ;;  %1359 = vmatpush1.bf16.msra.mxu1 %v2257_v9 }
 0x184   :  { %1274 = vmatprep.subr.bf16.mxu0 %v2262_v10  ;;  %1360 = vmatprep.subr.bf16.mxu1 %v2265_v11 }
 0x187   :  { %1275 = vmatpush1.bf16.msra.mxu0 %v2260_v12  ;;  %1361 = vmatpush1.bf16.msra.mxu1 %v2263_v13 }
 0x188   :  { %1953 = vmatprep.subr.bf16.mxu0 %v2266_v14  ;;  %1975 = vmatprep.subr.bf16.mxu1 %v2267_v15 }
 0x18a   :  { %1277 = vmatmul.mubr.bf16.vlgmr.msra.gmra.mrb[4].mxu0 %v2552_v21  ;;  %1363 = vmatmul.mubr.bf16.vlgmr.msra.gmra.mrb[4].mxu1 %v2552_v21  ;;  %v2281_v21 = vld [vmem:[#allocation9 + $0x98] sm:$0xff]  }
 0x18b   :  { %1954 = vmatpush3.bf16.msra.mxu0 %v2268_v16  ;;  %1976 = vmatpush3.bf16.msra.mxu1 %v2269_v17  ;;  %v1920_v17 = vld [vmem:[%s2588_s6] ss:$0 sm:$0xff]  ;;  %s2386_s6 = scalar_lea.vmem %s1746_s30, 256 }
 0x18c   :  { %1955 = vmatprep.subr.bf16.mxu0 %v2270_v18  ;;  %1977 = vmatprep.subr.bf16.mxu1 %v2271_v19  ;;  %p2387_p4 = scmp.ne.s32.totalorder %s1746_s30, %s2386_s6  ;;  %p2392_p6 = scmp.lt.s32.totalorder %s2386_s6, %s2386_s6 }
 0x18e   :  { %p2393_p7 = por %p2392_p6, %p2391_p5 }
 0x18f   :  { %1956 = vmatpush3.bf16.msra.mxu0 %v2272_v20  ;;  %1978 = vmatpush3.bf16.msra.mxu1 %v2273_v22 }
 0x190   :  { %1957 = vmatprep.subr.bf16.mxu0 %v2274_v23  ;;  %1979 = vmatprep.subr.bf16.mxu1 %v2275_v24  ;;  %p2394_p8 = pnand %p2393_p7, %p2387_p4 }
 0x193   :  { %1958 = vmatpush3.bf16.msra.mxu0 %v2276_v25  ;;  %1980 = vmatpush3.bf16.msra.mxu1 %v2277_v26 }
 0x194   :  { %1959 = vmatprep.subr.bf16.mxu0 %v2278_v27  ;;  %1981 = vmatprep.subr.bf16.mxu1 %v2279_v28 }
 0x197   :  { %1960 = vmatpush3.bf16.msra.mxu0 %v2280_v29  ;;  %1982 = vmatpush3.bf16.msra.mxu1 %v2281_v21 }
 0x198   :  { %1961 = vmatprep.subr.bf16.mxu0 %v2282_v30  ;;  %1983 = vmatprep.subr.bf16.mxu1 %v2283_v31 }
 0x19b   :  { %1962 = vmatpush3.bf16.msra.mxu0 %v2284_v32  ;;  %1984 = vmatpush3.bf16.msra.mxu1 %v2285_v33 }
 0x19c   :  { %1963 = vmatprep.subr.bf16.mxu0 %v2286_v34  ;;  %1985 = vmatprep.subr.bf16.mxu1 %v2287_v35 }
 0x19f   :  { %1964 = vmatpush3.bf16.msra.mxu0 %v2288_v36  ;;  %1986 = vmatpush3.bf16.msra.mxu1 %v2289_v39 }
 0x1a0   :  { %1965 = vmatprep.subr.bf16.mxu0 %v2290_v41  ;;  %1987 = vmatprep.subr.bf16.mxu1 %v2291_v42 }
 0x1a3   :  { %1966 = vmatpush3.bf16.msra.mxu0 %v2292_v43  ;;  %1988 = vmatpush3.bf16.msra.mxu1 %v2293_v44 }
 0x1a4   :  { %1967 = vmatprep.subr.bf16.mxu0 %v2294_v45  ;;  %1989 = vmatprep.subr.bf16.mxu1 %v2295_v46 }
 0x1a7   :  { %1968 = vmatpush3.bf16.msra.mxu0 %v2296_v47  ;;  %1990 = vmatpush3.bf16.msra.mxu1 %v2297_v48 }
 0x25d   :  { %v1278_v55 = vpop.f32.mrb[4].mxu0  ;;  %v1364_v57 = vpop.f32.mrb[4].mxu1 }
 0x25e   :  { %v1997_v58 = vadd.f32 %v1278_v55, %v544_v50  ;;  %v2001_v59 = vadd.f32 %v1364_v57, %v552_v51  ;;  %v1280_v60 = vpop.f32.mrb[5].mxu0  ;;  %v1366_v61 = vpop.f32.mrb[5].mxu1 }
 0x25f   :  { %v1998_v62 = vadd.f32 %v1280_v60, %v548_v52  ;;  %v2002_v63 = vadd.f32 %v1366_v61, %v556_v54  ;;  %v1282_v0 = vpop.f32.mrb[6].mxu0  ;;  %v1368_v1 = vpop.f32.mrb[6].mxu1 }
 0x260   :  { %v1999_v38 = vadd.f32 %v1282_v0, %v544_v50  ;;  %v2003_v2 = vadd.f32 %v1368_v1, %v552_v51  ;;  %v1284_v3 = vpop.f32.mrb[7].mxu0  ;;  %v1370_v53 = vpop.f32.mrb[7].mxu1  ;;  %v1373_v40 = vmax.f32 %v1997_v58, 0.0  ;;  %v1375_v6 = vmax.f32 %v2001_v59, 0.0 }
 0x261   :  { %v2000_v4 = vadd.f32 %v1284_v3, %v548_v52  ;;  %v2004_v5 = vadd.f32 %v1370_v53, %v556_v54  ;;  %v1374_v7 = vmax.f32 %v1998_v62, 0.0  ;;  %v1376_v8 = vmax.f32 %v2002_v63, 0.0 }
 0x262   :  { %v1377_v37 = vmax.f32 %v1999_v38, 0.0  ;;  %v1379_v56 = vmax.f32 %v2003_v2, 0.0 }
 0x263   :  { %v1378_v9 = vmax.f32 %v2000_v4, 0.0  ;;  %v1380_v10 = vmax.f32 %v2004_v5, 0.0 }
 0x264   :  { %v1381_v11 = vpack.c.bf16 %v1377_v37, %v1373_v40  ;;  %v1383_v12 = vpack.c.bf16 %v1379_v56, %v1375_v6 }
 0x265   :  { %v1382_v13 = vpack.c.bf16 %v1378_v9, %v1374_v7  ;;  %v1384_v14 = vpack.c.bf16 %v1380_v10, %v1376_v8 }
 0x267   :  { %1688 = vmatprep.mubr.bf16.mxu0 %v1382_v13  ;;  %1729 = vmatprep.mubr.bf16.mxu1 %v1384_v14 }
 0x268   :  { %1689 = vmatmul.mubr.bf16.vlgmr.msra.gmra.mrb[8].mxu0 %v1381_v11  ;;  %1730 = vmatmul.mubr.bf16.vlgmr.msra.gmra.mrb[8].mxu1 %v1383_v12 }
 0x33b   :  { %v1969_v15 = vpop.f32.mrb[8].mxu0  ;;  %v1991_v16 = vpop.f32.mrb[8].mxu1 }
 0x33c   :  { %v1970_v18 = vpop.f32.mrb[9].mxu0  ;;  %v1992_v19 = vpop.f32.mrb[9].mxu1 }
 0x33d   :  { %v1971_v20 = vadd.f32 %v1970_v18, %v1969_v15  ;;  %v1993_v22 = vadd.f32 %v1992_v19, %v1991_v16  ;;  %v1972_v23 = vpop.f32.mrb[10].mxu0  ;;  %v1994_v24 = vpop.f32.mrb[10].mxu1 }
 0x33e   :  { %v1973_v25 = vpop.f32.mrb[11].mxu0  ;;  %v1995_v26 = vpop.f32.mrb[11].mxu1 }
 0x33f   :  { %v1691_v27 = vadd.f32 %v1971_v20, %v1920_v17  ;;  %v1974_v28 = vadd.f32 %v1973_v25, %v1972_v23  ;;  %v1996_v29 = vadd.f32 %v1995_v26, %v1994_v24 }
 0x341   :  { %v1732_v21 = vadd.f32 %v1993_v22, %v1691_v27  ;;  %v1694_v30 = vadd.f32 %v1974_v28, %v1920_v17 }
 0x343   :  { %1738 = vst [vmem:[#allocation11] sm:$0xff] %v1732_v21  ;;  %v1735_v31 = vadd.f32 %v1996_v29, %v1694_v30 }
 0x345   :  { %1739 = vst [vmem:[#allocation11 + $0x8] sm:$0xff] %v1735_v31 }
 0x346   :  { %2397 = shalt.err (!%p2394_p8)
}
 0x347   :  { %s2398_s10 = scalar_lea.hbm %s2589_s7, 256 }
 0x348   :  { %p2399_p9 = scmp.ne.s32.totalorder %s2589_s7, %s2398_s10  ;;  %p2402_p10 = scmp.lt.u32.totalorder %s2398_s10, %s2589_s7 }
 0x34a   :  { %p2404_p11 = pnand %p2402_p10, %p2399_p9 }
 0x34c   :  { %2407 = shalt.err (!%p2404_p11)
}
 0x34d   :  { %s2426_s18 = smov 128   ;;  %s2427_s0 = smov 8  }
 0x34e   :  { %1751 = dma.vmem_to_hbm [thread:$0]  %s1746_s30, 256, %s2589_s7, [#allocation5], %s2426_s18, %s2426_s18, %s2427_s0  }
 0x34f   :  { %2414 = dma.done.wait [#allocation5], 256  }
 0x350   :  { %2415 = vsyncadd [#allocation5], 4294967040 }
 0x351   :  { %1755 = vsyncpa [#allocation4], 1 }
 0x352   :  { %1756 = vsyncpa [#allocation7], 1 }
 0x353   :  { %1757 = vsyncpa [#allocation10], 1 }
 0x354   :  { %1758 = vsyncpa [#allocation5], 1 }

</bundles_post_ra>
